<compile_context>
chip_gen: v7x
topology: tpu7x:2x2x1
jax: 0.10.0
libtpu: 0.0.40
codegen_flags: <defaults>
</compile_context>

<pallas_src>
import functools

import jax
import jax.numpy as jnp
from jax import lax
from jax.experimental import pallas as pl
from jax.experimental.pallas import tpu as pltpu


MATMUL_DTYPE = jnp.bfloat16  # MXU operand dtype; accumulation stays float32.


def _dot(a, b):
    """MXU matmul: bf16 operands, f32 accumulation."""
    return jnp.dot(a.astype(MATMUL_DTYPE), b.astype(MATMUL_DTYPE),
                   preferred_element_type=jnp.float32)


def _layernorm(x, g, b, eps):
    mu = jnp.mean(x, axis=-1, keepdims=True)
    var = jnp.mean((x - mu) ** 2, axis=-1, keepdims=True)
    return (x - mu) * jax.lax.rsqrt(var + eps) * g + b


# ----------------------------------------------------------------------------
# Kernel 1: whole BERT encoder as ONE pallas_call.
#   grid = (num_layers,); per step: fused QKV matmul + multi-head attention +
#   out proj + residual/LN + FFN(GELU) + residual/LN.  x resident in VMEM scratch
#   across layers; embedding layernorm folded into step 0.
# ----------------------------------------------------------------------------
def _bert_stack_kernel(num_heads, head_dim, num_layers, eps,
                       emb_ref, embln_ref, wqkv_ref, bqkv_ref, wo_ref,
                       vecd_ref, w1_ref, b1_ref, w2_ref,
                       o_ref, x_sc, ctx_sc):
    l = pl.program_id(0)

    @pl.when(l == 0)
    def _():
        # embedding layernorm (runs once, on the first grid step)
        x_sc[...] = _layernorm(emb_ref[...], embln_ref[0:1, :], embln_ref[1:2, :],
                               eps)

    x = x_sc[...]                                    # [S, D] f32
    D = x.shape[1]
    vecd = vecd_ref[0]                               # [6, D]: bo, ln1g, ln1b, b2, ln2g, ln2b

    # Fused Q/K/V projection (softmax scale already folded into the Q weights).
    qkv = _dot(x, wqkv_ref[0]) + bqkv_ref[0]         # [S, 3D]

    # Multi-head attention: heads sliced on the lane axis, scores via dot_general
    # (no explicit transpose), per-head context written into a VMEM scratch slice.
    for h in range(num_heads):
        lo = h * head_dim
        qh = qkv[:, lo:lo + head_dim]
        kh = qkv[:, D + lo:D + lo + head_dim]
        vh = qkv[:, 2 * D + lo:2 * D + lo + head_dim]
        s = lax.dot_general(qh.astype(MATMUL_DTYPE), kh.astype(MATMUL_DTYPE),
                            dimension_numbers=(((1,), (1,)), ((), ())),
                            preferred_element_type=jnp.float32)   # [S, S]
        s_max = jnp.max(s, axis=-1, keepdims=True)
        e = jnp.exp(s - s_max)
        p = e * pl.reciprocal(jnp.sum(e, axis=-1, keepdims=True), approx=True)
        ctx_sc[:, lo:lo + head_dim] = _dot(p, vh)    # [S, Dh]
    ctx = ctx_sc[...]                                # [S, D]

    attn_out = _dot(ctx, wo_ref[0]) + vecd[0:1, :]
    x = _layernorm(x + attn_out, vecd[1:2, :], vecd[2:3, :], eps)

    # FFN with GELU epilogue (tanh approximation: Mosaic-friendly transcendental).
    h1 = jax.nn.gelu(_dot(x, w1_ref[0]) + b1_ref[0], approximate=True)
    ffn_out = _dot(h1, w2_ref[0]) + vecd[3:4, :]
    x = _layernorm(x + ffn_out, vecd[4:5, :], vecd[5:6, :], eps)

    x_sc[...] = x                                    # carry to the next layer

    @pl.when(l == num_layers - 1)
    def _():
        o_ref[...] = x


def bert_encoder(params, token_ids, num_heads, eps=1e-12):
    S = token_ids.shape[0]
    # embeddings (gather is glue); the layernorm runs inside the stacked kernel.
    x_emb = (params["tok_emb"][token_ids]
             + params["pos_emb"][:S]
             + params["type_emb"][0][None, :])
    L, D, _ = params["wqkv"].shape
    F = params["w1"].shape[2]
    head_dim = D // num_heads

    grid_spec = pltpu.PrefetchScalarGridSpec(
        num_scalar_prefetch=0,
        grid=(L,),
        in_specs=[
            pl.BlockSpec((S, D), lambda l: (0, 0)),            # embeddings (resident)
            pl.BlockSpec((2, D), lambda l: (0, 0)),            # emb LN gamma/beta
            pl.BlockSpec((1, D, 3 * D), lambda l: (l, 0, 0)),  # wqkv (bf16)
            pl.BlockSpec((1, 1, 3 * D), lambda l: (l, 0, 0)),  # bqkv
            pl.BlockSpec((1, D, D), lambda l: (l, 0, 0)),      # wo (bf16)
            pl.BlockSpec((1, 6, D), lambda l: (l, 0, 0)),      # packed per-layer vecs
            pl.BlockSpec((1, D, F), lambda l: (l, 0, 0)),      # w1 (bf16)
            pl.BlockSpec((1, 1, F), lambda l: (l, 0, 0)),      # b1
            pl.BlockSpec((1, F, D), lambda l: (l, 0, 0)),      # w2 (bf16)
        ],
        out_specs=pl.BlockSpec((S, D), lambda l: (0, 0)),
        scratch_shapes=[pltpu.VMEM((S, D), jnp.float32),       # x carried across layers
                        pltpu.VMEM((S, D), jnp.float32)],      # attention context
    )
    return pl.pallas_call(
        functools.partial(_bert_stack_kernel, num_heads, head_dim, L, eps),
        out_shape=jax.ShapeDtypeStruct((S, D), jnp.float32),
        grid_spec=grid_spec,
        compiler_params=pltpu.CompilerParams(dimension_semantics=("arbitrary",)),
    )(x_emb, params["emb_ln"], params["wqkv"], params["bqkv"], params["wo"],
      params["vec_d"], params["w1"], params["b1"], params["w2"])


# ----------------------------------------------------------------------------
# Kernel 2: whole GearNet stack as ONE pallas_call.
#   grid = (num_layers,); per step: all per-relation neighbour aggregations as a
#   single [R*N, N] @ [N, Din] matmul, then the relation Linear as an accumulated
#   block matmul over relations, plus self-loop, bias, BatchNorm+ReLU, short-cut
#   residual.  Layer input carried in a VMEM scratch; all per-layer hiddens are
#   written to the output (concat_hidden=True).
# ----------------------------------------------------------------------------
def _gearnet_stack_kernel(num_relation, short_cut, eps,
                          adj_ref, x0_ref, wrel_ref, wself_ref, vech_ref,
                          o_ref, x_sc):
    l = pl.program_id(0)

    @pl.when(l == 0)
    def _():
        x_sc[...] = x0_ref[...]

    x = x_sc[...]                                    # [N, Din] f32
    N, din = x.shape
    a = adj_ref[...]                                 # [R*N, N] bf16, relation-stacked rows
    vech = vech_ref[0]                               # [3, H]: b, bn_g, bn_b
    wrel = wrel_ref[0]                               # [R*Din, H] bf16

    # (1) all per-relation neighbour aggregations in ONE matmul.
    m = _dot(a, x)                                   # [R*N, Din] f32

    # (2) self-loop + bias, then accumulate the per-relation block matmuls
    #     (identical to torchdrug's nn.Linear(num_relation * input_dim, output_dim)).
    y = _dot(x, wself_ref[0]) + vech[0:1, :]         # [N, H]
    for r in range(num_relation):
        y = y + _dot(m[r * N:(r + 1) * N, :], wrel[r * din:(r + 1) * din, :])

    # (3) fused BatchNorm1d over the node axis + ReLU.
    # TODO(synk): training-mode batch statistics; eval-mode running stats of the
    #             PyTorch model are not reproducible here.
    mu = jnp.mean(y, axis=0, keepdims=True)
    var = jnp.mean((y - mu) ** 2, axis=0, keepdims=True)
    y = (y - mu) * jax.lax.rsqrt(var + eps) * vech[1:2, :] + vech[2:3, :]
    y = jnp.maximum(y, 0.0)

    # (4) short_cut=True residual (shapes uniform in the stacked kernel).
    if short_cut:
        y = y + x

    x_sc[...] = y                                    # carry to the next layer
    o_ref[0] = y                                     # per-layer hidden (concat_hidden)


def gearnet(params, adj, node_input, eps=1e-5):
    R, N, _ = adj.shape
    adj_stack = adj.reshape(R * N, N).astype(MATMUL_DTYPE)   # 0/1 -> exact in bf16
    L, RDin, H = params["w_rel"].shape
    Din = node_input.shape[1]
    assert RDin == R * Din and Din == H, "stacked GearNet requires uniform layer dims"

    grid_spec = pltpu.PrefetchScalarGridSpec(
        num_scalar_prefetch=0,
        grid=(L,),
        in_specs=[
            pl.BlockSpec((R * N, N), lambda l: (0, 0)),        # adjacency (resident)
            pl.BlockSpec((N, Din), lambda l: (0, 0)),          # lm_output (resident)
            pl.BlockSpec((1, RDin, H), lambda l: (l, 0, 0)),   # relation weights (bf16)
            pl.BlockSpec((1, Din, H), lambda l: (l, 0, 0)),    # self-loop weights (bf16)
            pl.BlockSpec((1, 3, H), lambda l: (l, 0, 0)),      # packed b / bn_g / bn_b
        ],
        out_specs=pl.BlockSpec((1, N, H), lambda l: (l, 0, 0)),
        scratch_shapes=[pltpu.VMEM((N, Din), jnp.float32)],    # layer input carry
    )
    hiddens = pl.pallas_call(
        functools.partial(_gearnet_stack_kernel, R, True, eps),
        out_shape=jax.ShapeDtypeStruct((L, N, H), jnp.float32),
        grid_spec=grid_spec,
        compiler_params=pltpu.CompilerParams(dimension_semantics=("arbitrary",)),
    )(adj_stack, node_input, params["w_rel"], params["w_self"], params["vec_h"])

    # concat_hidden=True node features and 'sum' readout (glue on tiny arrays).
    node_feature = jnp.transpose(hiddens, (1, 0, 2)).reshape(N, L * H)
    graph_feature = jnp.sum(hiddens, axis=1).reshape(L * H)
    return {"graph_feature": graph_feature, "node_feature": node_feature}


# ----------------------------------------------------------------------------
# Model wrapper
# ----------------------------------------------------------------------------
def lm_gearnet_forward(params, token_ids, adj, *, num_heads):
    # ProtBert stand-in (pretrained weights / tokenizer not loadable here)
    last_hidden = bert_encoder(params["bert"], token_ids, num_heads)
    # x.last_hidden_state.squeeze()[1:-1]  (drop [CLS] / [SEP])
    lm_output = last_hidden[1:-1]
    # GearNet(graph, lm_output)
    return gearnet(params["gearnet"], adj, lm_output)


# ----------------------------------------------------------------------------
# Deterministic parameter initialization (configuration is STATIC, not traced).
# Matmul weights are stored stacked over layers in bf16; small vectors packed.
# ----------------------------------------------------------------------------
def init_params(key, *, vocab=30, max_pos=64, hidden=32, heads=2, ffn=64,
                bert_layers=2, gearnet_hidden=32, gearnet_layers=3,
                num_relation=7):
    def dense(k, fan_in, fan_out):
        return jax.random.normal(k, (fan_in, fan_out), jnp.float32) / jnp.sqrt(
            jnp.float32(fan_in))

    keys = iter(jax.random.split(key, 256))
    head_dim = hidden // heads
    scale = 1.0 / (head_dim ** 0.5)

    wqkv, bqkv, wo, vec_d, w1, b1, w2 = [], [], [], [], [], [], []
    for _ in range(bert_layers):
        wq = dense(next(keys), hidden, hidden) * scale   # fold 1/sqrt(Dh) into Q
        wk = dense(next(keys), hidden, hidden)
        wv = dense(next(keys), hidden, hidden)
        wqkv.append(jnp.concatenate([wq, wk, wv], axis=1))
        bqkv.append(jnp.zeros((1, 3 * hidden), jnp.float32))
        wo.append(dense(next(keys), hidden, hidden))
        vec_d.append(jnp.stack([
            jnp.zeros((hidden,), jnp.float32),   # bo
            jnp.ones((hidden,), jnp.float32),    # ln1_g
            jnp.zeros((hidden,), jnp.float32),   # ln1_b
            jnp.zeros((hidden,), jnp.float32),   # b2
            jnp.ones((hidden,), jnp.float32),    # ln2_g
            jnp.zeros((hidden,), jnp.float32),   # ln2_b
        ]))
        w1.append(dense(next(keys), hidden, ffn))
        b1.append(jnp.zeros((1, ffn), jnp.float32))
        w2.append(dense(next(keys), ffn, hidden))

    bert = {
        "tok_emb": 0.02 * jax.random.normal(next(keys), (vocab, hidden), jnp.float32),
        "pos_emb": 0.02 * jax.random.normal(next(keys), (max_pos, hidden), jnp.float32),
        "type_emb": 0.02 * jax.random.normal(next(keys), (2, hidden), jnp.float32),
        "emb_ln": jnp.stack([jnp.ones((hidden,), jnp.float32),
                             jnp.zeros((hidden,), jnp.float32)]),
        "wqkv": jnp.stack(wqkv).astype(MATMUL_DTYPE),
        "bqkv": jnp.stack(bqkv),
        "wo": jnp.stack(wo).astype(MATMUL_DTYPE),
        "vec_d": jnp.stack(vec_d),
        "w1": jnp.stack(w1).astype(MATMUL_DTYPE),
        "b1": jnp.stack(b1),
        "w2": jnp.stack(w2).astype(MATMUL_DTYPE),
    }

    assert hidden == gearnet_hidden, "stacked GearNet demo assumes uniform dims"
    w_rel, w_self, vec_h = [], [], []
    in_dim = hidden
    for _ in range(gearnet_layers):
        # block-stacked relation weights: one linear over R*Din (torchdrug layout)
        w_rel.append(jax.random.normal(
            next(keys), (num_relation * in_dim, gearnet_hidden), jnp.float32)
            / jnp.sqrt(jnp.float32(num_relation * in_dim)))
        w_self.append(dense(next(keys), in_dim, gearnet_hidden))
        vec_h.append(jnp.stack([
            jnp.zeros((gearnet_hidden,), jnp.float32),  # bias
            jnp.ones((gearnet_hidden,), jnp.float32),   # bn gamma
            jnp.zeros((gearnet_hidden,), jnp.float32),  # bn beta
        ]))
        in_dim = gearnet_hidden
    gnet = {
        "w_rel": jnp.stack(w_rel).astype(MATMUL_DTYPE),
        "w_self": jnp.stack(w_self).astype(MATMUL_DTYPE),
        "vec_h": jnp.stack(vec_h),
    }
    return {"bert": bert, "gearnet": gnet}


# ----------------------------------------------------------------------------
if __name__ == "__main__":
    key = jax.random.PRNGKey(0)
    k_tok, k_adj, k_par = jax.random.split(key, 3)

    NUM_NODES = 8          # residues in the protein graph
    NUM_RELATION = 7
    HIDDEN = 32
    HEADS = 2
    GEARNET_LAYERS = 3
    SEQ = NUM_NODES + 2    # [CLS] + residues + [SEP]

    # synthetic tokenized sequence ([CLS]=1, [SEP]=2, residues in [3, 25))
    residue_ids = jax.random.randint(k_tok, (NUM_NODES,), 3, 25)
    token_ids = jnp.concatenate(
        [jnp.array([1], jnp.int32), residue_ids.astype(jnp.int32),
         jnp.array([2], jnp.int32)])

    # dense relational adjacency [R, N, N] (row i receives from column j)
    adj = jax.random.bernoulli(
        k_adj, 0.3, (NUM_RELATION, NUM_NODES, NUM_NODES)).astype(jnp.float32)

    params = init_params(k_par, hidden=HIDDEN, heads=HEADS, ffn=64, bert_layers=2,
                         gearnet_hidden=HIDDEN, gearnet_layers=GEARNET_LAYERS,
                         num_relation=NUM_RELATION)

    fwd = jax.jit(lm_gearnet_forward, static_argnames=("num_heads",))
    out = fwd(params, token_ids, adj, num_heads=HEADS)
    jax.block_until_ready(out)

    assert out["node_feature"].shape == (NUM_NODES, HIDDEN * GEARNET_LAYERS)
    assert out["graph_feature"].shape == (HIDDEN * GEARNET_LAYERS,)
    assert bool(jnp.all(jnp.isfinite(out["node_feature"])))
    assert bool(jnp.all(jnp.isfinite(out["graph_feature"])))
    print("KERNEL_OK")
</pallas_src>

<mosaic_0001>
module attributes {stable_mosaic.version = 11 : i64} {
  func.func @_bert_stack_kernel(%arg0: i32, %arg1: memref<10x32xf32, #tpu.memory_space<vmem>>, %arg2: memref<2x32xf32, #tpu.memory_space<vmem>>, %arg3: memref<1x32x96xbf16, #tpu.memory_space<vmem>>, %arg4: memref<1x1x96xf32, #tpu.memory_space<vmem>>, %arg5: memref<1x32x32xbf16, #tpu.memory_space<vmem>>, %arg6: memref<1x6x32xf32, #tpu.memory_space<vmem>>, %arg7: memref<1x32x64xbf16, #tpu.memory_space<vmem>>, %arg8: memref<1x1x64xf32, #tpu.memory_space<vmem>>, %arg9: memref<1x64x32xbf16, #tpu.memory_space<vmem>>, %arg10: memref<10x32xf32, #tpu.memory_space<vmem>>, %arg11: memref<10x32xf32, #tpu.memory_space<vmem>>, %arg12: memref<10x32xf32, #tpu.memory_space<vmem>>) attributes {dimension_semantics = [#tpu.dimension_semantics<arbitrary>], iteration_bounds = array<i64: 2>, scalar_prefetch = 0 : i64, scratch_operands = 2 : i64, tpu.core_type = #tpu.core_type<tc>, window_params = [{pipeline_mode = #tpu.pipeline_mode<synchronous>, transform_indices = @transform_0, window_bounds = array<i64: 10, 32>}, {pipeline_mode = #tpu.pipeline_mode<synchronous>, transform_indices = @transform_1, window_bounds = array<i64: 2, 32>}, {transform_indices = @transform_2, window_bounds = array<i64: 1, 32, 96>}, {transform_indices = @transform_3, window_bounds = array<i64: 1, 1, 96>}, {transform_indices = @transform_4, window_bounds = array<i64: 1, 32, 32>}, {transform_indices = @transform_5, window_bounds = array<i64: 1, 6, 32>}, {transform_indices = @transform_6, window_bounds = array<i64: 1, 32, 64>}, {transform_indices = @transform_7, window_bounds = array<i64: 1, 1, 64>}, {transform_indices = @transform_8, window_bounds = array<i64: 1, 64, 32>}, {pipeline_mode = #tpu.pipeline_mode<synchronous>, transform_indices = @transform_9, window_bounds = array<i64: 10, 32>}]} {
    %c0_i32 = arith.constant 0 : i32
    %0 = arith.cmpi eq, %arg0, %c0_i32 : i32
    %1 = arith.extui %0 : i1 to i32
    %c0_i32_0 = arith.constant 0 : i32
    %2 = arith.cmpi ne, %1, %c0_i32_0 : i32
    scf.if %2 {
      %c0_56 = arith.constant 0 : index
      %c0_57 = arith.constant 0 : index
      %144 = vector.load %arg1[%c0_56, %c0_57] : memref<10x32xf32, #tpu.memory_space<vmem>>, vector<10x32xf32>
      %c0_58 = arith.constant 0 : index
      %c0_59 = arith.constant 0 : index
      %145 = vector.load %arg2[%c0_58, %c0_59] : memref<2x32xf32, #tpu.memory_space<vmem>>, vector<1x32xf32>
      %c1 = arith.constant 1 : index
      %c0_60 = arith.constant 0 : index
      %146 = vector.load %arg2[%c1, %c0_60] : memref<2x32xf32, #tpu.memory_space<vmem>>, vector<1x32xf32>
      %cst_61 = arith.constant dense<0.000000e+00> : vector<10xf32>
      %147 = vector.multi_reduction <add>, %144, %cst_61 [1] : vector<10x32xf32> to vector<10xf32>
      %148 = vector.shape_cast %147 : vector<10xf32> to vector<10x1xf32>
      %cst_62 = arith.constant 3.200000e+01 : f32
      %149 = vector.broadcast %cst_62 : f32 to vector<10x1xf32>
      %150 = arith.divf %148, %149 : vector<10x1xf32>
      %151 = vector.broadcast %150 : vector<10x1xf32> to vector<10x32xf32>
      %152 = arith.subf %144, %151 : vector<10x32xf32>
      %153 = arith.mulf %152, %152 : vector<10x32xf32>
      %cst_63 = arith.constant dense<0.000000e+00> : vector<10xf32>
      %154 = vector.multi_reduction <add>, %153, %cst_63 [1] : vector<10x32xf32> to vector<10xf32>
      %155 = vector.shape_cast %154 : vector<10xf32> to vector<10x1xf32>
      %cst_64 = arith.constant 3.200000e+01 : f32
      %156 = vector.broadcast %cst_64 : f32 to vector<10x1xf32>
      %157 = arith.divf %155, %156 : vector<10x1xf32>
      %158 = vector.broadcast %150 : vector<10x1xf32> to vector<10x32xf32>
      %159 = arith.subf %144, %158 : vector<10x32xf32>
      %cst_65 = arith.constant 9.99999996E-13 : f32
      %160 = vector.broadcast %cst_65 : f32 to vector<10x1xf32>
      %161 = arith.addf %157, %160 : vector<10x1xf32>
      %162 = math.rsqrt %161 : vector<10x1xf32>
      %163 = vector.broadcast %162 : vector<10x1xf32> to vector<10x32xf32>
      %164 = arith.mulf %159, %163 : vector<10x32xf32>
      %165 = vector.broadcast %145 : vector<1x32xf32> to vector<10x32xf32>
      %166 = arith.mulf %164, %165 : vector<10x32xf32>
      %167 = vector.broadcast %146 : vector<1x32xf32> to vector<10x32xf32>
      %168 = arith.addf %166, %167 : vector<10x32xf32>
      %c0_66 = arith.constant 0 : index
      %c0_67 = arith.constant 0 : index
      %169 = vector.load %arg11[%c0_66, %c0_67] : memref<10x32xf32, #tpu.memory_space<vmem>>, vector<10x32xf32>
      tpu.vector_store %arg11[%c0_66, %c0_67], %168 {strides = array<i32>} : memref<10x32xf32, #tpu.memory_space<vmem>>, vector<10x32xf32>,
    } else {
    }
    %c0 = arith.constant 0 : index
    %c0_1 = arith.constant 0 : index
    %3 = vector.load %arg11[%c0, %c0_1] : memref<10x32xf32, #tpu.memory_space<vmem>>, vector<10x32xf32>
    %c0_2 = arith.constant 0 : index
    %c0_3 = arith.constant 0 : index
    %c0_4 = arith.constant 0 : index
    %4 = vector.load %arg6[%c0_2, %c0_3, %c0_4] : memref<1x6x32xf32, #tpu.memory_space<vmem>>, vector<1x6x32xf32>
    %5 = vector.shape_cast %4 : vector<1x6x32xf32> to vector<6x32xf32>
    %c0_5 = arith.constant 0 : index
    %c0_6 = arith.constant 0 : index
    %c0_7 = arith.constant 0 : index
    %6 = vector.load %arg3[%c0_5, %c0_6, %c0_7] : memref<1x32x96xbf16, #tpu.memory_space<vmem>>, vector<1x32x96xbf16>
    %7 = vector.shape_cast %6 : vector<1x32x96xbf16> to vector<32x96xbf16>
    %8 = arith.truncf %3 : vector<10x32xf32> to vector<10x32xbf16>
    %cst = arith.constant dense<0.000000e+00> : vector<10x96xf32>
    %9 = tpu.matmul %8, %7, %cst {dimension_numbers = #tpu.dot_dimension_numbers<[1], [0], [0], [1], [0, 0, 1, 1], [], []>} : vector<10x32xbf16>, vector<32x96xbf16>, vector<10x96xf32> -> vector<10x96xf32>
    %c0_8 = arith.constant 0 : index
    %c0_9 = arith.constant 0 : index
    %c0_10 = arith.constant 0 : index
    %10 = vector.load %arg4[%c0_8, %c0_9, %c0_10] : memref<1x1x96xf32, #tpu.memory_space<vmem>>, vector<1x1x96xf32>
    %11 = vector.shape_cast %10 : vector<1x1x96xf32> to vector<1x96xf32>
    %12 = vector.broadcast %11 : vector<1x96xf32> to vector<10x96xf32>
    %13 = arith.addf %9, %12 : vector<10x96xf32>
    %14 = vector.extract_strided_slice %13 {offsets = [0, 0], sizes = [10, 16], strides = [1, 1]} : vector<10x96xf32> to vector<10x16xf32>
    %15 = vector.extract_strided_slice %13 {offsets = [0, 32], sizes = [10, 16], strides = [1, 1]} : vector<10x96xf32> to vector<10x16xf32>
    %16 = vector.extract_strided_slice %13 {offsets = [0, 64], sizes = [10, 16], strides = [1, 1]} : vector<10x96xf32> to vector<10x16xf32>
    %17 = arith.truncf %14 : vector<10x16xf32> to vector<10x16xbf16>
    %18 = arith.truncf %15 : vector<10x16xf32> to vector<10x16xbf16>
    %cst_11 = arith.constant dense<0.000000e+00> : vector<10x10xf32>
    %19 = tpu.matmul %17, %18, %cst_11 {dimension_numbers = #tpu.dot_dimension_numbers<[1], [1], [0], [0], [0, 0, 1, 0], [], []>} : vector<10x16xbf16>, vector<10x16xbf16>, vector<10x10xf32> -> vector<10x10xf32>
    %cst_12 = arith.constant dense<0xFF800000> : vector<10xf32>
    %20 = vector.multi_reduction <maximumf>, %19, %cst_12 [1] : vector<10x10xf32> to vector<10xf32>
    %21 = vector.shape_cast %20 : vector<10xf32> to vector<10x1xf32>
    %22 = vector.broadcast %21 : vector<10x1xf32> to vector<10x10xf32>
    %23 = arith.subf %19, %22 : vector<10x10xf32>
    %24 = math.exp %23 : vector<10x10xf32>
    %cst_13 = arith.constant dense<0.000000e+00> : vector<10xf32>
    %25 = vector.multi_reduction <add>, %24, %cst_13 [1] : vector<10x10xf32> to vector<10xf32>
    %26 = vector.shape_cast %25 : vector<10xf32> to vector<10x1xf32>
    %27 = tpu.reciprocal %26 {approx = true} : vector<10x1xf32> -> vector<10x1xf32>
    %28 = vector.broadcast %27 : vector<10x1xf32> to vector<10x10xf32>
    %29 = arith.mulf %24, %28 : vector<10x10xf32>
    %30 = arith.truncf %29 : vector<10x10xf32> to vector<10x10xbf16>
    %31 = arith.truncf %16 : vector<10x16xf32> to vector<10x16xbf16>
    %cst_14 = arith.constant dense<0.000000e+00> : vector<10x16xf32>
    %32 = tpu.matmul %30, %31, %cst_14 {dimension_numbers = #tpu.dot_dimension_numbers<[1], [0], [0], [1], [0, 0, 1, 1], [], []>} : vector<10x10xbf16>, vector<10x16xbf16>, vector<10x16xf32> -> vector<10x16xf32>
    %c0_15 = arith.constant 0 : index
    %c0_16 = arith.constant 0 : index
    %33 = vector.load %arg12[%c0_15, %c0_16] : memref<10x32xf32, #tpu.memory_space<vmem>>, vector<10x16xf32>
    tpu.vector_store %arg12[%c0_15, %c0_16], %32 {strides = array<i32>} : memref<10x32xf32, #tpu.memory_space<vmem>>, vector<10x16xf32>,
    %34 = vector.extract_strided_slice %13 {offsets = [0, 16], sizes = [10, 16], strides = [1, 1]} : vector<10x96xf32> to vector<10x16xf32>
    %35 = vector.extract_strided_slice %13 {offsets = [0, 48], sizes = [10, 16], strides = [1, 1]} : vector<10x96xf32> to vector<10x16xf32>
    %36 = vector.extract_strided_slice %13 {offsets = [0, 80], sizes = [10, 16], strides = [1, 1]} : vector<10x96xf32> to vector<10x16xf32>
    %37 = arith.truncf %34 : vector<10x16xf32> to vector<10x16xbf16>
    %38 = arith.truncf %35 : vector<10x16xf32> to vector<10x16xbf16>
    %cst_17 = arith.constant dense<0.000000e+00> : vector<10x10xf32>
    %39 = tpu.matmul %37, %38, %cst_17 {dimension_numbers = #tpu.dot_dimension_numbers<[1], [1], [0], [0], [0, 0, 1, 0], [], []>} : vector<10x16xbf16>, vector<10x16xbf16>, vector<10x10xf32> -> vector<10x10xf32>
    %cst_18 = arith.constant dense<0xFF800000> : vector<10xf32>
    %40 = vector.multi_reduction <maximumf>, %39, %cst_18 [1] : vector<10x10xf32> to vector<10xf32>
    %41 = vector.shape_cast %40 : vector<10xf32> to vector<10x1xf32>
    %42 = vector.broadcast %41 : vector<10x1xf32> to vector<10x10xf32>
    %43 = arith.subf %39, %42 : vector<10x10xf32>
    %44 = math.exp %43 : vector<10x10xf32>
    %cst_19 = arith.constant dense<0.000000e+00> : vector<10xf32>
    %45 = vector.multi_reduction <add>, %44, %cst_19 [1] : vector<10x10xf32> to vector<10xf32>
    %46 = vector.shape_cast %45 : vector<10xf32> to vector<10x1xf32>
    %47 = tpu.reciprocal %46 {approx = true} : vector<10x1xf32> -> vector<10x1xf32>
    %48 = vector.broadcast %47 : vector<10x1xf32> to vector<10x10xf32>
    %49 = arith.mulf %44, %48 : vector<10x10xf32>
    %50 = arith.truncf %49 : vector<10x10xf32> to vector<10x10xbf16>
    %51 = arith.truncf %36 : vector<10x16xf32> to vector<10x16xbf16>
    %cst_20 = arith.constant dense<0.000000e+00> : vector<10x16xf32>
    %52 = tpu.matmul %50, %51, %cst_20 {dimension_numbers = #tpu.dot_dimension_numbers<[1], [0], [0], [1], [0, 0, 1, 1], [], []>} : vector<10x10xbf16>, vector<10x16xbf16>, vector<10x16xf32> -> vector<10x16xf32>
    %c0_21 = arith.constant 0 : index
    %c16 = arith.constant 16 : index
    %53 = vector.load %arg12[%c0_21, %c16] : memref<10x32xf32, #tpu.memory_space<vmem>>, vector<10x16xf32>
    tpu.vector_store %arg12[%c0_21, %c16], %52 {strides = array<i32>} : memref<10x32xf32, #tpu.memory_space<vmem>>, vector<10x16xf32>,
    %c0_22 = arith.constant 0 : index
    %c0_23 = arith.constant 0 : index
    %54 = vector.load %arg12[%c0_22, %c0_23] : memref<10x32xf32, #tpu.memory_space<vmem>>, vector<10x32xf32>
    %c0_24 = arith.constant 0 : index
    %c0_25 = arith.constant 0 : index
    %c0_26 = arith.constant 0 : index
    %55 = vector.load %arg5[%c0_24, %c0_25, %c0_26] : memref<1x32x32xbf16, #tpu.memory_space<vmem>>, vector<1x32x32xbf16>
    %56 = vector.shape_cast %55 : vector<1x32x32xbf16> to vector<32x32xbf16>
    %57 = arith.truncf %54 : vector<10x32xf32> to vector<10x32xbf16>
    %cst_27 = arith.constant dense<0.000000e+00> : vector<10x32xf32>
    %58 = tpu.matmul %57, %56, %cst_27 {dimension_numbers = #tpu.dot_dimension_numbers<[1], [0], [0], [1], [0, 0, 1, 1], [], []>} : vector<10x32xbf16>, vector<32x32xbf16>, vector<10x32xf32> -> vector<10x32xf32>
    %59 = vector.extract_strided_slice %5 {offsets = [0, 0], sizes = [1, 32], strides = [1, 1]} : vector<6x32xf32> to vector<1x32xf32>
    %60 = vector.broadcast %59 : vector<1x32xf32> to vector<10x32xf32>
    %61 = arith.addf %58, %60 : vector<10x32xf32>
    %62 = arith.addf %3, %61 : vector<10x32xf32>
    %63 = vector.extract_strided_slice %5 {offsets = [1, 0], sizes = [1, 32], strides = [1, 1]} : vector<6x32xf32> to vector<1x32xf32>
    %64 = vector.extract_strided_slice %5 {offsets = [2, 0], sizes = [1, 32], strides = [1, 1]} : vector<6x32xf32> to vector<1x32xf32>
    %cst_28 = arith.constant dense<0.000000e+00> : vector<10xf32>
    %65 = vector.multi_reduction <add>, %62, %cst_28 [1] : vector<10x32xf32> to vector<10xf32>
    %66 = vector.shape_cast %65 : vector<10xf32> to vector<10x1xf32>
    %cst_29 = arith.constant 3.200000e+01 : f32
    %67 = vector.broadcast %cst_29 : f32 to vector<10x1xf32>
    %68 = arith.divf %66, %67 : vector<10x1xf32>
    %69 = vector.broadcast %68 : vector<10x1xf32> to vector<10x32xf32>
    %70 = arith.subf %62, %69 : vector<10x32xf32>
    %71 = arith.mulf %70, %70 : vector<10x32xf32>
    %cst_30 = arith.constant dense<0.000000e+00> : vector<10xf32>
    %72 = vector.multi_reduction <add>, %71, %cst_30 [1] : vector<10x32xf32> to vector<10xf32>
    %73 = vector.shape_cast %72 : vector<10xf32> to vector<10x1xf32>
    %cst_31 = arith.constant 3.200000e+01 : f32
    %74 = vector.broadcast %cst_31 : f32 to vector<10x1xf32>
    %75 = arith.divf %73, %74 : vector<10x1xf32>
    %76 = vector.broadcast %68 : vector<10x1xf32> to vector<10x32xf32>
    %77 = arith.subf %62, %76 : vector<10x32xf32>
    %cst_32 = arith.constant 9.99999996E-13 : f32
    %78 = vector.broadcast %cst_32 : f32 to vector<10x1xf32>
    %79 = arith.addf %75, %78 : vector<10x1xf32>
    %80 = math.rsqrt %79 : vector<10x1xf32>
    %81 = vector.broadcast %80 : vector<10x1xf32> to vector<10x32xf32>
    %82 = arith.mulf %77, %81 : vector<10x32xf32>
    %83 = vector.broadcast %63 : vector<1x32xf32> to vector<10x32xf32>
    %84 = arith.mulf %82, %83 : vector<10x32xf32>
    %85 = vector.broadcast %64 : vector<1x32xf32> to vector<10x32xf32>
    %86 = arith.addf %84, %85 : vector<10x32xf32>
    %c0_33 = arith.constant 0 : index
    %c0_34 = arith.constant 0 : index
    %c0_35 = arith.constant 0 : index
    %87 = vector.load %arg7[%c0_33, %c0_34, %c0_35] : memref<1x32x64xbf16, #tpu.memory_space<vmem>>, vector<1x32x64xbf16>
    %88 = vector.shape_cast %87 : vector<1x32x64xbf16> to vector<32x64xbf16>
    %89 = arith.truncf %86 : vector<10x32xf32> to vector<10x32xbf16>
    %cst_36 = arith.constant dense<0.000000e+00> : vector<10x64xf32>
    %90 = tpu.matmul %89, %88, %cst_36 {dimension_numbers = #tpu.dot_dimension_numbers<[1], [0], [0], [1], [0, 0, 1, 1], [], []>} : vector<10x32xbf16>, vector<32x64xbf16>, vector<10x64xf32> -> vector<10x64xf32>
    %c0_37 = arith.constant 0 : index
    %c0_38 = arith.constant 0 : index
    %c0_39 = arith.constant 0 : index
    %91 = vector.load %arg8[%c0_37, %c0_38, %c0_39] : memref<1x1x64xf32, #tpu.memory_space<vmem>>, vector<1x1x64xf32>
    %92 = vector.shape_cast %91 : vector<1x1x64xf32> to vector<1x64xf32>
    %93 = vector.broadcast %92 : vector<1x64xf32> to vector<10x64xf32>
    %94 = arith.addf %90, %93 : vector<10x64xf32>
    %95 = arith.mulf %94, %94 : vector<10x64xf32>
    %96 = arith.mulf %94, %95 : vector<10x64xf32>
    %cst_40 = arith.constant 4.471500e-02 : f32
    %97 = vector.broadcast %cst_40 : f32 to vector<10x64xf32>
    %98 = arith.mulf %97, %96 : vector<10x64xf32>
    %99 = arith.addf %94, %98 : vector<10x64xf32>
    %cst_41 = arith.constant 0.797884583 : f32
    %100 = vector.broadcast %cst_41 : f32 to vector<10x64xf32>
    %101 = arith.mulf %100, %99 : vector<10x64xf32>
    %102 = math.tanh %101 : vector<10x64xf32>
    %cst_42 = arith.constant 1.000000e+00 : f32
    %103 = vector.broadcast %cst_42 : f32 to vector<10x64xf32>
    %104 = arith.addf %103, %102 : vector<10x64xf32>
    %cst_43 = arith.constant 5.000000e-01 : f32
    %105 = vector.broadcast %cst_43 : f32 to vector<10x64xf32>
    %106 = arith.mulf %105, %104 : vector<10x64xf32>
    %107 = arith.mulf %94, %106 : vector<10x64xf32>
    %c0_44 = arith.constant 0 : index
    %c0_45 = arith.constant 0 : index
    %c0_46 = arith.constant 0 : index
    %108 = vector.load %arg9[%c0_44, %c0_45, %c0_46] : memref<1x64x32xbf16, #tpu.memory_space<vmem>>, vector<1x64x32xbf16>
    %109 = vector.shape_cast %108 : vector<1x64x32xbf16> to vector<64x32xbf16>
    %110 = arith.truncf %107 : vector<10x64xf32> to vector<10x64xbf16>
    %cst_47 = arith.constant dense<0.000000e+00> : vector<10x32xf32>
    %111 = tpu.matmul %110, %109, %cst_47 {dimension_numbers = #tpu.dot_dimension_numbers<[1], [0], [0], [1], [0, 0, 1, 1], [], []>} : vector<10x64xbf16>, vector<64x32xbf16>, vector<10x32xf32> -> vector<10x32xf32>
    %112 = vector.extract_strided_slice %5 {offsets = [3, 0], sizes = [1, 32], strides = [1, 1]} : vector<6x32xf32> to vector<1x32xf32>
    %113 = vector.broadcast %112 : vector<1x32xf32> to vector<10x32xf32>
    %114 = arith.addf %111, %113 : vector<10x32xf32>
    %115 = arith.addf %86, %114 : vector<10x32xf32>
    %116 = vector.extract_strided_slice %5 {offsets = [4, 0], sizes = [1, 32], strides = [1, 1]} : vector<6x32xf32> to vector<1x32xf32>
    %117 = vector.extract_strided_slice %5 {offsets = [5, 0], sizes = [1, 32], strides = [1, 1]} : vector<6x32xf32> to vector<1x32xf32>
    %cst_48 = arith.constant dense<0.000000e+00> : vector<10xf32>
    %118 = vector.multi_reduction <add>, %115, %cst_48 [1] : vector<10x32xf32> to vector<10xf32>
    %119 = vector.shape_cast %118 : vector<10xf32> to vector<10x1xf32>
    %cst_49 = arith.constant 3.200000e+01 : f32
    %120 = vector.broadcast %cst_49 : f32 to vector<10x1xf32>
    %121 = arith.divf %119, %120 : vector<10x1xf32>
    %122 = vector.broadcast %121 : vector<10x1xf32> to vector<10x32xf32>
    %123 = arith.subf %115, %122 : vector<10x32xf32>
    %124 = arith.mulf %123, %123 : vector<10x32xf32>
    %cst_50 = arith.constant dense<0.000000e+00> : vector<10xf32>
    %125 = vector.multi_reduction <add>, %124, %cst_50 [1] : vector<10x32xf32> to vector<10xf32>
    %126 = vector.shape_cast %125 : vector<10xf32> to vector<10x1xf32>
    %cst_51 = arith.constant 3.200000e+01 : f32
    %127 = vector.broadcast %cst_51 : f32 to vector<10x1xf32>
    %128 = arith.divf %126, %127 : vector<10x1xf32>
    %129 = vector.broadcast %121 : vector<10x1xf32> to vector<10x32xf32>
    %130 = arith.subf %115, %129 : vector<10x32xf32>
    %cst_52 = arith.constant 9.99999996E-13 : f32
    %131 = vector.broadcast %cst_52 : f32 to vector<10x1xf32>
    %132 = arith.addf %128, %131 : vector<10x1xf32>
    %133 = math.rsqrt %132 : vector<10x1xf32>
    %134 = vector.broadcast %133 : vector<10x1xf32> to vector<10x32xf32>
    %135 = arith.mulf %130, %134 : vector<10x32xf32>
    %136 = vector.broadcast %116 : vector<1x32xf32> to vector<10x32xf32>
    %137 = arith.mulf %135, %136 : vector<10x32xf32>
    %138 = vector.broadcast %117 : vector<1x32xf32> to vector<10x32xf32>
    %139 = arith.addf %137, %138 : vector<10x32xf32>
    %c0_53 = arith.constant 0 : index
    %c0_54 = arith.constant 0 : index
    %140 = vector.load %arg11[%c0_53, %c0_54] : memref<10x32xf32, #tpu.memory_space<vmem>>, vector<10x32xf32>
    tpu.vector_store %arg11[%c0_53, %c0_54], %139 {strides = array<i32>} : memref<10x32xf32, #tpu.memory_space<vmem>>, vector<10x32xf32>,
    %c1_i32 = arith.constant 1 : i32
    %141 = arith.cmpi eq, %arg0, %c1_i32 : i32
    %142 = arith.extui %141 : i1 to i32
    %c0_i32_55 = arith.constant 0 : i32
    %143 = arith.cmpi ne, %142, %c0_i32_55 : i32
    scf.if %143 {
      %c0_56 = arith.constant 0 : index
      %c0_57 = arith.constant 0 : index
      %144 = vector.load %arg10[%c0_56, %c0_57] : memref<10x32xf32, #tpu.memory_space<vmem>>, vector<10x32xf32>
      tpu.vector_store %arg10[%c0_56, %c0_57], %139 {strides = array<i32>} : memref<10x32xf32, #tpu.memory_space<vmem>>, vector<10x32xf32>,
    } else {
    }
    return
  }
  func.func @transform_0(%arg0: i32) -> (i32, i32) {
    %c0_i32 = arith.constant 0 : i32
    %c0_i32_0 = arith.constant 0 : i32
    %c0_i32_1 = arith.constant 0 : i32
    return %c0_i32, %c0_i32_0 : i32, i32
  }
  func.func @transform_1(%arg0: i32) -> (i32, i32) {
    %c0_i32 = arith.constant 0 : i32
    %c0_i32_0 = arith.constant 0 : i32
    %c0_i32_1 = arith.constant 0 : i32
    return %c0_i32, %c0_i32_0 : i32, i32
  }
  func.func @transform_2(%arg0: i32) -> (i32, i32, i32) {
    %c0_i32 = arith.constant 0 : i32
    %c0_i32_0 = arith.constant 0 : i32
    %c0_i32_1 = arith.constant 0 : i32
    return %arg0, %c0_i32, %c0_i32_0 : i32, i32, i32
  }
  func.func @transform_3(%arg0: i32) -> (i32, i32, i32) {
    %c0_i32 = arith.constant 0 : i32
    %c0_i32_0 = arith.constant 0 : i32
    %c0_i32_1 = arith.constant 0 : i32
    return %arg0, %c0_i32, %c0_i32_0 : i32, i32, i32
  }
  func.func @transform_4(%arg0: i32) -> (i32, i32, i32) {
    %c0_i32 = arith.constant 0 : i32
    %c0_i32_0 = arith.constant 0 : i32
    %c0_i32_1 = arith.constant 0 : i32
    return %arg0, %c0_i32, %c0_i32_0 : i32, i32, i32
  }
  func.func @transform_5(%arg0: i32) -> (i32, i32, i32) {
    %c0_i32 = arith.constant 0 : i32
    %c0_i32_0 = arith.constant 0 : i32
    %c0_i32_1 = arith.constant 0 : i32
    return %arg0, %c0_i32, %c0_i32_0 : i32, i32, i32
  }
  func.func @transform_6(%arg0: i32) -> (i32, i32, i32) {
    %c0_i32 = arith.constant 0 : i32
    %c0_i32_0 = arith.constant 0 : i32
    %c0_i32_1 = arith.constant 0 : i32
    return %arg0, %c0_i32, %c0_i32_0 : i32, i32, i32
  }
  func.func @transform_7(%arg0: i32) -> (i32, i32, i32) {
    %c0_i32 = arith.constant 0 : i32
    %c0_i32_0 = arith.constant 0 : i32
    %c0_i32_1 = arith.constant 0 : i32
    return %arg0, %c0_i32, %c0_i32_0 : i32, i32, i32
  }
  func.func @transform_8(%arg0: i32) -> (i32, i32, i32) {
    %c0_i32 = arith.constant 0 : i32
    %c0_i32_0 = arith.constant 0 : i32
    %c0_i32_1 = arith.constant 0 : i32
    return %arg0, %c0_i32, %c0_i32_0 : i32, i32, i32
  }
  func.func @transform_9(%arg0: i32) -> (i32, i32) {
    %c0_i32 = arith.constant 0 : i32
    %c0_i32_0 = arith.constant 0 : i32
    %c0_i32_1 = arith.constant 0 : i32
    return %c0_i32, %c0_i32_0 : i32, i32
  }
}

module attributes {stable_mosaic.version = 11 : i64} {
  func.func @_gearnet_stack_kernel(%arg0: i32, %arg1: memref<56x8xbf16, #tpu.memory_space<vmem>>, %arg2: memref<8x32xf32, #tpu.memory_space<vmem>>, %arg3: memref<1x224x32xbf16, #tpu.memory_space<vmem>>, %arg4: memref<1x32x32xbf16, #tpu.memory_space<vmem>>, %arg5: memref<1x3x32xf32, #tpu.memory_space<vmem>>, %arg6: memref<1x8x32xf32, #tpu.memory_space<vmem>>, %arg7: memref<8x32xf32, #tpu.memory_space<vmem>>) attributes {dimension_semantics = [#tpu.dimension_semantics<arbitrary>], iteration_bounds = array<i64: 3>, scalar_prefetch = 0 : i64, scratch_operands = 1 : i64, tpu.core_type = #tpu.core_type<tc>, window_params = [{pipeline_mode = #tpu.pipeline_mode<synchronous>, transform_indices = @transform_0, window_bounds = array<i64: 56, 8>}, {pipeline_mode = #tpu.pipeline_mode<synchronous>, transform_indices = @transform_1, window_bounds = array<i64: 8, 32>}, {transform_indices = @transform_2, window_bounds = array<i64: 1, 224, 32>}, {transform_indices = @transform_3, window_bounds = array<i64: 1, 32, 32>}, {transform_indices = @transform_4, window_bounds = array<i64: 1, 3, 32>}, {transform_indices = @transform_5, window_bounds = array<i64: 1, 8, 32>}]} {
    %c0_i32 = arith.constant 0 : i32
    %0 = arith.cmpi eq, %arg0, %c0_i32 : i32
    %1 = arith.extui %0 : i1 to i32
    %c0_i32_0 = arith.constant 0 : i32
    %2 = arith.cmpi ne, %1, %c0_i32_0 : i32
    scf.if %2 {
      %c0_32 = arith.constant 0 : index
      %c0_33 = arith.constant 0 : index
      %84 = vector.load %arg2[%c0_32, %c0_33] : memref<8x32xf32, #tpu.memory_space<vmem>>, vector<8x32xf32>
      %c0_34 = arith.constant 0 : index
      %c0_35 = arith.constant 0 : index
      %85 = vector.load %arg7[%c0_34, %c0_35] : memref<8x32xf32, #tpu.memory_space<vmem>>, vector<8x32xf32>
      tpu.vector_store %arg7[%c0_34, %c0_35], %84 {strides = array<i32>} : memref<8x32xf32, #tpu.memory_space<vmem>>, vector<8x32xf32>,
    } else {
    }
    %c0 = arith.constant 0 : index
    %c0_1 = arith.constant 0 : index
    %3 = vector.load %arg7[%c0, %c0_1] : memref<8x32xf32, #tpu.memory_space<vmem>>, vector<8x32xf32>
    %c0_2 = arith.constant 0 : index
    %c0_3 = arith.constant 0 : index
    %4 = vector.load %arg1[%c0_2, %c0_3] : memref<56x8xbf16, #tpu.memory_space<vmem>>, vector<56x8xbf16>
    %c0_4 = arith.constant 0 : index
    %c0_5 = arith.constant 0 : index
    %c0_6 = arith.constant 0 : index
    %5 = vector.load %arg5[%c0_4, %c0_5, %c0_6] : memref<1x3x32xf32, #tpu.memory_space<vmem>>, vector<1x3x32xf32>
    %6 = vector.shape_cast %5 : vector<1x3x32xf32> to vector<3x32xf32>
    %c0_7 = arith.constant 0 : index
    %c0_8 = arith.constant 0 : index
    %c0_9 = arith.constant 0 : index
    %7 = vector.load %arg3[%c0_7, %c0_8, %c0_9] : memref<1x224x32xbf16, #tpu.memory_space<vmem>>, vector<1x224x32xbf16>
    %8 = vector.shape_cast %7 : vector<1x224x32xbf16> to vector<224x32xbf16>
    %9 = arith.truncf %3 : vector<8x32xf32> to vector<8x32xbf16>
    %cst = arith.constant dense<0.000000e+00> : vector<56x32xf32>
    %10 = tpu.matmul %4, %9, %cst {dimension_numbers = #tpu.dot_dimension_numbers<[1], [0], [0], [1], [0, 0, 1, 1], [], []>} : vector<56x8xbf16>, vector<8x32xbf16>, vector<56x32xf32> -> vector<56x32xf32>
    %c0_10 = arith.constant 0 : index
    %c0_11 = arith.constant 0 : index
    %c0_12 = arith.constant 0 : index
    %11 = vector.load %arg4[%c0_10, %c0_11, %c0_12] : memref<1x32x32xbf16, #tpu.memory_space<vmem>>, vector<1x32x32xbf16>
    %12 = vector.shape_cast %11 : vector<1x32x32xbf16> to vector<32x32xbf16>
    %13 = arith.truncf %3 : vector<8x32xf32> to vector<8x32xbf16>
    %cst_13 = arith.constant dense<0.000000e+00> : vector<8x32xf32>
    %14 = tpu.matmul %13, %12, %cst_13 {dimension_numbers = #tpu.dot_dimension_numbers<[1], [0], [0], [1], [0, 0, 1, 1], [], []>} : vector<8x32xbf16>, vector<32x32xbf16>, vector<8x32xf32> -> vector<8x32xf32>
    %15 = vector.extract_strided_slice %6 {offsets = [0, 0], sizes = [1, 32], strides = [1, 1]} : vector<3x32xf32> to vector<1x32xf32>
    %16 = vector.broadcast %15 : vector<1x32xf32> to vector<8x32xf32>
    %17 = arith.addf %14, %16 : vector<8x32xf32>
    %18 = vector.extract_strided_slice %10 {offsets = [0, 0], sizes = [8, 32], strides = [1, 1]} : vector<56x32xf32> to vector<8x32xf32>
    %19 = vector.extract_strided_slice %8 {offsets = [0, 0], sizes = [32, 32], strides = [1, 1]} : vector<224x32xbf16> to vector<32x32xbf16>
    %20 = arith.truncf %18 : vector<8x32xf32> to vector<8x32xbf16>
    %cst_14 = arith.constant dense<0.000000e+00> : vector<8x32xf32>
    %21 = tpu.matmul %20, %19, %cst_14 {dimension_numbers = #tpu.dot_dimension_numbers<[1], [0], [0], [1], [0, 0, 1, 1], [], []>} : vector<8x32xbf16>, vector<32x32xbf16>, vector<8x32xf32> -> vector<8x32xf32>
    %22 = arith.addf %17, %21 : vector<8x32xf32>
    %23 = vector.extract_strided_slice %10 {offsets = [8, 0], sizes = [8, 32], strides = [1, 1]} : vector<56x32xf32> to vector<8x32xf32>
    %24 = vector.extract_strided_slice %8 {offsets = [32, 0], sizes = [32, 32], strides = [1, 1]} : vector<224x32xbf16> to vector<32x32xbf16>
    %25 = arith.truncf %23 : vector<8x32xf32> to vector<8x32xbf16>
    %cst_15 = arith.constant dense<0.000000e+00> : vector<8x32xf32>
    %26 = tpu.matmul %25, %24, %cst_15 {dimension_numbers = #tpu.dot_dimension_numbers<[1], [0], [0], [1], [0, 0, 1, 1], [], []>} : vector<8x32xbf16>, vector<32x32xbf16>, vector<8x32xf32> -> vector<8x32xf32>
    %27 = arith.addf %22, %26 : vector<8x32xf32>
    %28 = vector.extract_strided_slice %10 {offsets = [16, 0], sizes = [8, 32], strides = [1, 1]} : vector<56x32xf32> to vector<8x32xf32>
    %29 = vector.extract_strided_slice %8 {offsets = [64, 0], sizes = [32, 32], strides = [1, 1]} : vector<224x32xbf16> to vector<32x32xbf16>
    %30 = arith.truncf %28 : vector<8x32xf32> to vector<8x32xbf16>
    %cst_16 = arith.constant dense<0.000000e+00> : vector<8x32xf32>
    %31 = tpu.matmul %30, %29, %cst_16 {dimension_numbers = #tpu.dot_dimension_numbers<[1], [0], [0], [1], [0, 0, 1, 1], [], []>} : vector<8x32xbf16>, vector<32x32xbf16>, vector<8x32xf32> -> vector<8x32xf32>
    %32 = arith.addf %27, %31 : vector<8x32xf32>
    %33 = vector.extract_strided_slice %10 {offsets = [24, 0], sizes = [8, 32], strides = [1, 1]} : vector<56x32xf32> to vector<8x32xf32>
    %34 = vector.extract_strided_slice %8 {offsets = [96, 0], sizes = [32, 32], strides = [1, 1]} : vector<224x32xbf16> to vector<32x32xbf16>
    %35 = arith.truncf %33 : vector<8x32xf32> to vector<8x32xbf16>
    %cst_17 = arith.constant dense<0.000000e+00> : vector<8x32xf32>
    %36 = tpu.matmul %35, %34, %cst_17 {dimension_numbers = #tpu.dot_dimension_numbers<[1], [0], [0], [1], [0, 0, 1, 1], [], []>} : vector<8x32xbf16>, vector<32x32xbf16>, vector<8x32xf32> -> vector<8x32xf32>
    %37 = arith.addf %32, %36 : vector<8x32xf32>
    %38 = vector.extract_strided_slice %10 {offsets = [32, 0], sizes = [8, 32], strides = [1, 1]} : vector<56x32xf32> to vector<8x32xf32>
    %39 = vector.extract_strided_slice %8 {offsets = [128, 0], sizes = [32, 32], strides = [1, 1]} : vector<224x32xbf16> to vector<32x32xbf16>
    %40 = arith.truncf %38 : vector<8x32xf32> to vector<8x32xbf16>
    %cst_18 = arith.constant dense<0.000000e+00> : vector<8x32xf32>
    %41 = tpu.matmul %40, %39, %cst_18 {dimension_numbers = #tpu.dot_dimension_numbers<[1], [0], [0], [1], [0, 0, 1, 1], [], []>} : vector<8x32xbf16>, vector<32x32xbf16>, vector<8x32xf32> -> vector<8x32xf32>
    %42 = arith.addf %37, %41 : vector<8x32xf32>
    %43 = vector.extract_strided_slice %10 {offsets = [40, 0], sizes = [8, 32], strides = [1, 1]} : vector<56x32xf32> to vector<8x32xf32>
    %44 = vector.extract_strided_slice %8 {offsets = [160, 0], sizes = [32, 32], strides = [1, 1]} : vector<224x32xbf16> to vector<32x32xbf16>
    %45 = arith.truncf %43 : vector<8x32xf32> to vector<8x32xbf16>
    %cst_19 = arith.constant dense<0.000000e+00> : vector<8x32xf32>
    %46 = tpu.matmul %45, %44, %cst_19 {dimension_numbers = #tpu.dot_dimension_numbers<[1], [0], [0], [1], [0, 0, 1, 1], [], []>} : vector<8x32xbf16>, vector<32x32xbf16>, vector<8x32xf32> -> vector<8x32xf32>
    %47 = arith.addf %42, %46 : vector<8x32xf32>
    %48 = vector.extract_strided_slice %10 {offsets = [48, 0], sizes = [8, 32], strides = [1, 1]} : vector<56x32xf32> to vector<8x32xf32>
    %49 = vector.extract_strided_slice %8 {offsets = [192, 0], sizes = [32, 32], strides = [1, 1]} : vector<224x32xbf16> to vector<32x32xbf16>
    %50 = arith.truncf %48 : vector<8x32xf32> to vector<8x32xbf16>
    %cst_20 = arith.constant dense<0.000000e+00> : vector<8x32xf32>
    %51 = tpu.matmul %50, %49, %cst_20 {dimension_numbers = #tpu.dot_dimension_numbers<[1], [0], [0], [1], [0, 0, 1, 1], [], []>} : vector<8x32xbf16>, vector<32x32xbf16>, vector<8x32xf32> -> vector<8x32xf32>
    %52 = arith.addf %47, %51 : vector<8x32xf32>
    %cst_21 = arith.constant dense<0.000000e+00> : vector<32xf32>
    %53 = vector.multi_reduction <add>, %52, %cst_21 [0] : vector<8x32xf32> to vector<32xf32>
    %54 = vector.shape_cast %53 : vector<32xf32> to vector<1x32xf32>
    %cst_22 = arith.constant 8.000000e+00 : f32
    %55 = vector.broadcast %cst_22 : f32 to vector<1x32xf32>
    %56 = arith.divf %54, %55 : vector<1x32xf32>
    %57 = vector.broadcast %56 : vector<1x32xf32> to vector<8x32xf32>
    %58 = arith.subf %52, %57 : vector<8x32xf32>
    %59 = arith.mulf %58, %58 : vector<8x32xf32>
    %cst_23 = arith.constant dense<0.000000e+00> : vector<32xf32>
    %60 = vector.multi_reduction <add>, %59, %cst_23 [0] : vector<8x32xf32> to vector<32xf32>
    %61 = vector.shape_cast %60 : vector<32xf32> to vector<1x32xf32>
    %cst_24 = arith.constant 8.000000e+00 : f32
    %62 = vector.broadcast %cst_24 : f32 to vector<1x32xf32>
    %63 = arith.divf %61, %62 : vector<1x32xf32>
    %64 = vector.broadcast %56 : vector<1x32xf32> to vector<8x32xf32>
    %65 = arith.subf %52, %64 : vector<8x32xf32>
    %cst_25 = arith.constant 9.99999974E-6 : f32
    %66 = vector.broadcast %cst_25 : f32 to vector<1x32xf32>
    %67 = arith.addf %63, %66 : vector<1x32xf32>
    %68 = math.rsqrt %67 : vector<1x32xf32>
    %69 = vector.broadcast %68 : vector<1x32xf32> to vector<8x32xf32>
    %70 = arith.mulf %65, %69 : vector<8x32xf32>
    %71 = vector.extract_strided_slice %6 {offsets = [1, 0], sizes = [1, 32], strides = [1, 1]} : vector<3x32xf32> to vector<1x32xf32>
    %72 = vector.broadcast %71 : vector<1x32xf32> to vector<8x32xf32>
    %73 = arith.mulf %70, %72 : vector<8x32xf32>
    %74 = vector.extract_strided_slice %6 {offsets = [2, 0], sizes = [1, 32], strides = [1, 1]} : vector<3x32xf32> to vector<1x32xf32>
    %75 = vector.broadcast %74 : vector<1x32xf32> to vector<8x32xf32>
    %76 = arith.addf %73, %75 : vector<8x32xf32>
    %cst_26 = arith.constant 0.000000e+00 : f32
    %77 = vector.broadcast %cst_26 : f32 to vector<8x32xf32>
    %78 = arith.maximumf %76, %77 : vector<8x32xf32>
    %79 = arith.addf %78, %3 : vector<8x32xf32>
    %c0_27 = arith.constant 0 : index
    %c0_28 = arith.constant 0 : index
    %80 = vector.load %arg7[%c0_27, %c0_28] : memref<8x32xf32, #tpu.memory_space<vmem>>, vector<8x32xf32>
    tpu.vector_store %arg7[%c0_27, %c0_28], %79 {strides = array<i32>} : memref<8x32xf32, #tpu.memory_space<vmem>>, vector<8x32xf32>,
    %c0_29 = arith.constant 0 : index
    %c0_30 = arith.constant 0 : index
    %c0_31 = arith.constant 0 : index
    %81 = vector.load %arg6[%c0_29, %c0_30, %c0_31] : memref<1x8x32xf32, #tpu.memory_space<vmem>>, vector<1x8x32xf32>
    %82 = vector.shape_cast %81 : vector<1x8x32xf32> to vector<8x32xf32>
    %83 = vector.shape_cast %79 : vector<8x32xf32> to vector<1x8x32xf32>
    tpu.vector_store %arg6[%c0_29, %c0_30, %c0_31], %83 {strides = array<i32>} : memref<1x8x32xf32, #tpu.memory_space<vmem>>, vector<1x8x32xf32>,
    return
  }
  func.func @transform_0(%arg0: i32) -> (i32, i32) {
    %c0_i32 = arith.constant 0 : i32
    %c0_i32_0 = arith.constant 0 : i32
    %c0_i32_1 = arith.constant 0 : i32
    return %c0_i32, %c0_i32_0 : i32, i32
  }
  func.func @transform_1(%arg0: i32) -> (i32, i32) {
    %c0_i32 = arith.constant 0 : i32
    %c0_i32_0 = arith.constant 0 : i32
    %c0_i32_1 = arith.constant 0 : i32
    return %c0_i32, %c0_i32_0 : i32, i32
  }
  func.func @transform_2(%arg0: i32) -> (i32, i32, i32) {
    %c0_i32 = arith.constant 0 : i32
    %c0_i32_0 = arith.constant 0 : i32
    %c0_i32_1 = arith.constant 0 : i32
    return %arg0, %c0_i32, %c0_i32_0 : i32, i32, i32
  }
  func.func @transform_3(%arg0: i32) -> (i32, i32, i32) {
    %c0_i32 = arith.constant 0 : i32
    %c0_i32_0 = arith.constant 0 : i32
    %c0_i32_1 = arith.constant 0 : i32
    return %arg0, %c0_i32, %c0_i32_0 : i32, i32, i32
  }
  func.func @transform_4(%arg0: i32) -> (i32, i32, i32) {
    %c0_i32 = arith.constant 0 : i32
    %c0_i32_0 = arith.constant 0 : i32
    %c0_i32_1 = arith.constant 0 : i32
    return %arg0, %c0_i32, %c0_i32_0 : i32, i32, i32
  }
  func.func @transform_5(%arg0: i32) -> (i32, i32, i32) {
    %c0_i32 = arith.constant 0 : i32
    %c0_i32_0 = arith.constant 0 : i32
    %c0_i32_1 = arith.constant 0 : i32
    return %arg0, %c0_i32, %c0_i32_0 : i32, i32, i32
  }
}

</mosaic_0001>

<bundles_post_ra>
// kernel: lm_gearnet_forward.3
= control target key start
LH: loop header
LB: loop body
LE: loop exit
PB: predicated region body
PF: predicated region fallthrough
CT: control target
= control target key end

     0   :  { %s1229_s18 = smov 0   ;;  %s1346_s0 = inlined_call_operand.vmem [shape: bf16[56,8], index: 0, kind: input, shape index: {}]   ;;  %s1347_s1 = inlined_call_operand.vmem [shape: f32[8,32], index: 1, kind: input, shape index: {}]   ;;  %s1348_s2 = inlined_call_operand.vmem [shape: bf16[3,224,32], index: 2, kind: input, shape index: {}]   ;;  %s1349_s3 = inlined_call_operand.vmem [shape: bf16[3,32,32], index: 3, kind: input, shape index: {}]   ;;  %s1350_s4 = inlined_call_operand.vmem [shape: f32[3,3,32], index: 4, kind: input, shape index: {}]   ;;  %s1351_s5 = inlined_call_operand.vmem [shape: f32[3,8,32], index: 5, kind: output, shape index: {}]  }
   0x1 LB: > { %s980_s19 = sadd.s32 4294967295, %s1195_s18   ;;  %p984_p0 = scmp.ge.s32.totalorder %s1195_s18, 1  ;;  %s1195_s18 = sphi %s1229_s18, %s15_s18  }
   0x2   : > { %p206_p1 = scmp.lt.s32.totalorder %s1195_s18, 4 }
   0x4   : > { %p207_p2 = pnand %p984_p0, %p206_p1 }
   0x5   : > { %p242_p3 = scmp.lt.s32.totalorder (!%p207_p2), %s980_s19, 2  ;;  %p990_p4 = scmp.ne.s32.totalorder (!%p207_p2), %s980_s19, 0 }
   0x6   : > { %210 = sbr.rel (%p207_p2) target bundleno = 563 (0x233), region = 40 }
   0xd   : > { %s243_s20 = scalar_select %p242_p3, %s980_s19, 2 }
   0xe   : > { %264 = sbr.rel (%p990_p4) target bundleno = 21 (0x15), region = 44  ;;  %v265_v0 = vld [vmem:[%s1347_s1] sm:$0xff] (!%p990_p4)  ;;  %vm266_vm0 = vcmask (!%p990_p4), 261120  }
   0xf   : > { %s1156_s21 = smul.u32 112, %s243_s20  ;;  %s1025_s22 = sshll.u32 %s243_s20, 4  ;;  %267 = vst.msk [vmem:[#allocation2] sm:$0xff] (!%p990_p4), %vm266_vm0, %v265_v0 }
  0x10   : > { %s1240_s25 = scalar_lea.vmem %s1349_s3, %s1025_s22  ;;  %s988_s26 = sshll.u32 %s243_s20, 2 }
  0x11   : > { %s1245_s29 = scalar_lea.vmem %s1348_s2, %s1156_s21  ;;  %s1250_s7 = scalar_lea.vmem %s1350_s4, %s988_s26 }
  0x12   : > { %s989_s8 = sshll.u32 %s243_s20, 3 }
  0x13   : > { %s1255_s11 = scalar_lea.vmem %s1351_s5, %s989_s8 }
  0x15 PF: > { %vm337_vm1 = vcmask 1043456   ;;  %v1167_v3 = vld [vmem:[%s1346_s0] sm:$0xff]   ;;  %vm324_vm2 = vcmask 64512   ;;  %v1168_v5 = vld [vmem:[%s1346_s0 + $0x8] sm:$0xff]   ;;  %v1169_v6 = vld [vmem:[%s1346_s0 + $0x10] sm:$0xff]   ;;  %v1197_v8 = vmov 0.0   ;;  %v409_v44 = vlaneseq }
  0x16   : > { %v1260_v1 = vld [vmem:[#allocation2] sm:$0xff]  ;;  %1057 = vmatprep.mubr.msk.bf16.mxu0 %vm324_vm2, %v1167_v3  ;;  %1089 = vmatprep.subr.bf16.mxu1 %v1197_v8  ;;  %vm1198_vm3 = vmmov 0   ;;  %v1172_v10 = vld [vmem:[%s1240_s25 + $0x8] sm:$0xff]   ;;  %v1170_v12 = vld [vmem:[%s1346_s0 + $0x18] ss:$0 sps:$4 sm:$0xff]   ;;  %vm425_vm4 = vcmask 261120  }
  0x17   : > { %v305_v2 = vpack.c.bf16 %v1260_v1, %v1260_v1  ;;  %v1171_v7 = vld [vmem:[%s1240_s25] sm:$0xff]   ;;  %1093 = vmatprep.mubr.msk.bf16.mxu1 %vm1198_vm3, %v1197_v8  ;;  %v1175_v11 = vld [vmem:[%s1245_s29 + $0x28] sm:$0xff]   ;;  %v1177_v16 = vld [vmem:[%s1245_s29 + $0x30] sm:$0xff]   ;;  %v410_v45 = vshrl.u32 %v409_v44, 7 }
  0x18   : > { %v1173_v9 = vld [vmem:[%s1245_s29 + $0x20] sm:$0xff]   ;;  %v1176_v14 = vld [vmem:[%s1245_s29 + $0x8] sm:$0xff]   ;;  %v1178_v19 = vld [vmem:[%s1245_s29 + $0x10] sm:$0xff]  }
  0x19   : > { %1155 = vmatprep.subr.msk.bf16.mxu0 %vm337_vm1, %v305_v2  ;;  %v339_v4 = vsel %vm337_vm1, %v305_v2, 0  ;;  %1090 = vmatpush3.bf16.msra.mxu1 %v1173_v9  ;;  %v1174_v13 = vld [vmem:[%s1245_s29] sm:$0xff]   ;;  %v1179_v23 = vld [vmem:[%s1245_s29 + $0x38] sm:$0xff]   ;;  %v1182_v32 = vld [vmem:[%s1245_s29 + $0x48] sm:$0xff]   ;;  %v411_v46 = vsub.s32 0, %v410_v45 }
  0x1a   : > { %1056 = vmatpush3.bf16.msra.mxu0 %v339_v4  ;;  %1091 = vmatprep.subr.bf16.mxu1 %v1197_v8  ;;  %v1180_v24 = vld [vmem:[%s1245_s29 + $0x18] sm:$0xff]   ;;  %v1181_v29 = vld [vmem:[%s1245_s29 + $0x40] sm:$0xff]   ;;  %v1183_v34 = vld [vmem:[%s1245_s29 + $0x50] sm:$0xff]  }
  0x1b   : > { %1065 = vmatprep.subr.bf16.mxu0 %v1197_v8  ;;  %v1184_v35 = vld [vmem:[%s1245_s29 + $0x58] sm:$0xff]   ;;  %v1185_v36 = vld [vmem:[%s1245_s29 + $0x60] sm:$0xff]   ;;  %v1186_v38 = vld [vmem:[%s1245_s29 + $0x68] sm:$0xff]  }
  0x1c   : > { %v276_v47 = vld [vmem:[%s1250_s7] sm:$0x7] }
  0x1d   : > { %1058 = vmatmul.mubr.msk.bf16.vlgmr.msra.gmra.mrb[0].mxu0 %vm324_vm2, %v1168_v5  ;;  %1092 = vmatpush3.bf16.msra.mxu1 %v1175_v11  ;;  %v412_v48 = vrot.slane %v276_v47, %v411_v46  ;;  %v891_v11 = vsub.s32 1, %v410_v45 }
  0x1e   : > { %1061 = vmatprep.mubr.msk.bf16.mxu0 %vm324_vm2, %v1169_v6  ;;  %1066 = vmatpush3.bf16.msra.mxu0 %v1171_v7 }
  0x1f   : > { %1067 = vmatprep.subr.bf16.mxu0 %v1197_v8  ;;  %1097 = vmatprep.subr.bf16.mxu1 %v1197_v8 }
  0x22   : > { %1068 = vmatpush3.bf16.msra.mxu0 %v1172_v10 }
  0x23   : > { %1073 = vmatprep.subr.bf16.mxu0 %v1197_v8 }
  0x25   : > { %1062 = vmatmul.mubr.msk.bf16.gmra.mrb[4].mxu0 %vm324_vm2, %v1170_v12  ;;  %v896_v12 = vsub.s32 2, %v410_v45 }
  0x26   : > { %1069 = vmatprep.mubr.msk.bf16.mxu0 %vm1198_vm3, %v1197_v8 }
  0x2d   : > { %1070 = vmatmul.mubr.msk.bf16.vlgmr.msra.gmra.mrb[8].mxu0 %vm425_vm4, %v305_v2 }
  0x2e   : > { %1074 = vmatpush3.bf16.msra.mxu0 %v1174_v13  ;;  %1077 = vmatprep.mubr.msk.bf16.mxu0 %vm1198_vm3, %v1197_v8  ;;  %v892_v13 = vrot.slane %v276_v47, %v891_v11 }
  0x2f   : > { %1075 = vmatprep.subr.bf16.mxu0 %v1197_v8 }
  0x32   : > { %1076 = vmatpush3.bf16.msra.mxu0 %v1176_v14 }
  0x33   : > { %1081 = vmatprep.subr.bf16.mxu0 %v1197_v8 }
  0xf0   : > { %v1059_v15 = vpop.f32.mrb[0].mxu0 }
  0xf1   : > { %v582_v17 = vpack.c.bf16 %v1059_v15, %v1059_v15  ;;  %v375_v18 = vpop.f32.mrb[1].mxu0  ;;  %v897_v15 = vrot.slane %v276_v47, %v896_v12 }
  0xf2   : > { %v468_v20 = vpack.c.bf16 %v375_v18, %v375_v18  ;;  %v1060_v21 = vpop.f32.mrb[2].mxu0 }
  0xf3   : > { %v378_v22 = vpop.f32.mrb[3].mxu0  ;;  %1094 = vmatmul.mubr.msk.bf16.vlgmr.msra.gmra.mrb[0].mxu1 %vm425_vm4, %v582_v17  ;;  %v639_v30 = vpack.c.bf16 %v1060_v21, %v1060_v21 }
  0xf4   : > { %1098 = vmatpush3.bf16.msra.mxu1 %v1177_v16  ;;  %1078 = vmatmul.mubr.msk.bf16.vlgmr.msra.gmra.mrb[8].mxu0 %vm425_vm4, %v468_v20  ;;  %v525_v31 = vpack.c.bf16 %v378_v22, %v378_v22 }
  0xf5   : > { %1099 = vmatprep.subr.bf16.mxu1 %v1197_v8  ;;  %1082 = vmatpush3.bf16.msra.mxu0 %v1178_v19 }
  0xf6   : > { %1083 = vmatprep.subr.bf16.mxu0 %v1197_v8  ;;  %1101 = vmatprep.mubr.msk.bf16.mxu1 %vm1198_vm3, %v1197_v8 }
  0xf7   : > { %1085 = vmatprep.mubr.msk.bf16.mxu0 %vm1198_vm3, %v1197_v8 }
  0xf8   : > { %1100 = vmatpush3.bf16.msra.mxu1 %v1179_v23  ;;  %v1063_v25 = vpop.f32.mrb[4].mxu0 }
  0xf9   : > { %1084 = vmatpush3.bf16.msra.mxu0 %v1180_v24  ;;  %1105 = vmatprep.subr.bf16.mxu1 %v1197_v8  ;;  %v391_v26 = vpop.f32.mrb[5].mxu0  ;;  %v810_v39 = vpack.c.bf16 %v1063_v25, %v1063_v25 }
  0xfa   : > { %v1064_v27 = vpop.f32.mrb[6].mxu0  ;;  %v696_v33 = vpack.c.bf16 %v391_v26, %v391_v26 }
  0xfb   : > { %v394_v28 = vpop.f32.mrb[7].mxu0 }
  0xfc   : > { %v753_v37 = vpack.c.bf16 %v394_v28, %v394_v28 }
  0xff   : > { %1102 = vmatmul.mubr.msk.bf16.vlgmr.msra.gmra.mrb[0].mxu1 %vm425_vm4, %v639_v30 }
 0x100   : > { %1106 = vmatpush3.bf16.msra.mxu1 %v1181_v29  ;;  %1086 = vmatmul.mubr.msk.bf16.vlgmr.msra.gmra.mrb[8].mxu0 %vm425_vm4, %v525_v31 }
 0x101   : > { %1107 = vmatprep.subr.bf16.mxu1 %v1197_v8  ;;  %1109 = vmatprep.mubr.msk.bf16.mxu1 %vm1198_vm3, %v1197_v8 }
 0x104   : > { %1108 = vmatpush3.bf16.msra.mxu1 %v1182_v32 }
 0x105   : > { %1113 = vmatprep.subr.bf16.mxu1 %v1197_v8 }
 0x10b   : > { %1110 = vmatmul.mubr.msk.bf16.vlgmr.msra.gmra.mrb[0].mxu1 %vm425_vm4, %v696_v33 }
 0x10c   : > { %1114 = vmatpush3.bf16.msra.mxu1 %v1183_v34  ;;  %1117 = vmatprep.mubr.msk.bf16.mxu1 %vm1198_vm3, %v1197_v8 }
 0x10d   : > { %1115 = vmatprep.subr.bf16.mxu1 %v1197_v8 }
 0x110   : > { %1116 = vmatpush3.bf16.msra.mxu1 %v1184_v35 }
 0x111   : > { %1121 = vmatprep.subr.bf16.mxu1 %v1197_v8 }
 0x117   : > { %1118 = vmatmul.mubr.msk.bf16.vlgmr.msra.gmra.mrb[0].mxu1 %vm425_vm4, %v753_v37 }
 0x118   : > { %1122 = vmatpush3.bf16.msra.mxu1 %v1185_v36  ;;  %1125 = vmatprep.mubr.msk.bf16.mxu1 %vm1198_vm3, %v1197_v8 }
 0x119   : > { %1123 = vmatprep.subr.bf16.mxu1 %v1197_v8 }
 0x11c   : > { %1124 = vmatpush3.bf16.msra.mxu1 %v1186_v38 }
 0x123   : > { %1126 = vmatmul.mubr.msk.bf16.vlgmr.msra.gmra.mrb[0].mxu1 %vm425_vm4, %v810_v39 }
 0x1d3   : > { %v575_v40 = vpop.f32.mrb[8].mxu0 }
 0x1d4   : > { %v1087_v41 = vpop.f32.mrb[9].mxu0  ;;  %v1129_v49 = vadd.f32 %v575_v40, %v412_v48 }
 0x1d5   : > { %v578_v42 = vpop.f32.mrb[10].mxu0 }
 0x1d6   : > { %v1088_v43 = vpop.f32.mrb[11].mxu0 }
 0x1f6   : > { %v860_v50 = vpop.f32.mrb[0].mxu1 }
 0x1f7   : > { %v1130_v51 = vadd.f32 %v1129_v49, %v860_v50  ;;  %v1127_v52 = vpop.f32.mrb[1].mxu1 }
 0x1f8   : > { %v863_v53 = vpop.f32.mrb[2].mxu1 }
 0x1f9   : > { %v867_v54 = vsel %vm425_vm4, %v1130_v51, 0.0  ;;  %v1128_v55 = vpop.f32.mrb[3].mxu1 }
 0x1fa   : > { %v868_v56 = vrot.slane %v867_v54, 4 }
 0x1fc   : > { %v869_v57 = vadd.f32 %v868_v56, %v867_v54 }
 0x1fe   : > { %v870_v58 = vrot.slane %v869_v57, 2 }
 0x200   : > { %v871_v59 = vadd.f32 %v870_v58, %v869_v57 }
 0x202   : > { %v872_v60 = vrot.slane %v871_v59, 1 }
 0x204   : > { %v873_v61 = vadd.f32 %v872_v60, %v871_v59 }
 0x206   : > { %v875_v62 = vmul.f32 0.125, %v873_v61 }
 0x208   : > { %v876_v63 = vsub.f32 %v1130_v51, %v875_v62 }
 0x20a   : > { %v877_v0 = vmul.f32 %v876_v63, %v876_v63 }
 0x20c   : > { %v878_v2 = vsel %vm425_vm4, %v877_v0, 0.0 }
 0x20d   : > { %v879_v3 = vrot.slane %v878_v2, 4 }
 0x20f   : > { %v880_v4 = vadd.f32 %v879_v3, %v878_v2 }
 0x211   : > { %v881_v5 = vrot.slane %v880_v4, 2 }
 0x213   : > { %v882_v6 = vadd.f32 %v881_v5, %v880_v4 }
 0x215   : > { %v883_v7 = vrot.slane %v882_v6, 1 }
 0x217   : > { %v884_v8 = vadd.f32 %v883_v7, %v882_v6 }
 0x219   : > { %v885_v9 = vmul.f32 0.125, %v884_v8 }
 0x21b   : > { %v886_v10 = vadd.f32 1e-05, %v885_v9 }
 0x21d   : > { %1187 = vrsqrt.f32 %v886_v10 }
 0x227   : > { %v1188_v14 = vpop.eup %1187 }
 0x228   : > { %v888_v16 = vmul.f32 %v1188_v14, %v876_v63 }
 0x22a   : > { %v893_v17 = vmul.f32 %v892_v13, %v888_v16 }
 0x22c   : > { %v898_v18 = vadd.f32 %v897_v15, %v893_v17 }
 0x22e   : > { %v899_v19 = vmax.f32 %v898_v18, 0.0 }
 0x230   : > { %v900_v20 = vadd.f32 %v899_v19, %v1260_v1 }
 0x232   : > { %901 = vst.msk [vmem:[#allocation2] sm:$0xff] %vm425_vm4, %v900_v20  ;;  %902 = vst.msk [vmem:[%s1255_s11] sm:$0xff] %vm425_vm4, %v900_v20 }
 0x233 PF: > { %s15_s18 = sadd.s32 1, %s1195_s18  }
 0x234   : > { %p12_p5 = scmp.ge.s32.totalorder %s15_s18, 5  }
 0x236   :  { %14 = sbr.rel (!%p12_p5) target bundleno = 1 (0x1), region = 80 }

// kernel: lm_gearnet_forward.2
= control target key start
LH: loop header
LB: loop body
LE: loop exit
PB: predicated region body
PF: predicated region fallthrough
CT: control target
= control target key end

     0   :  { %s1480_s30 = smov 0   ;;  %s1672_s0 = inlined_call_operand.vmem [shape: f32[10,32], index: 0, kind: input, shape index: {}]   ;;  %s1673_s1 = inlined_call_operand.vmem [shape: f32[2,32], index: 1, kind: input, shape index: {}]   ;;  %s1674_s2 = inlined_call_operand.vmem [shape: bf16[2,32,96], index: 2, kind: input, shape index: {}]   ;;  %s1675_s3 = inlined_call_operand.vmem [shape: f32[2,1,96], index: 3, kind: input, shape index: {}]   ;;  %s1676_s4 = inlined_call_operand.vmem [shape: bf16[2,32,32], index: 4, kind: input, shape index: {}]   ;;  %s1677_s5 = inlined_call_operand.vmem [shape: f32[2,6,32], index: 5, kind: input, shape index: {}]   ;;  %s1678_s6 = inlined_call_operand.vmem [shape: bf16[2,32,64], index: 6, kind: input, shape index: {}]   ;;  %s1679_s7 = inlined_call_operand.vmem [shape: f32[2,1,64], index: 7, kind: input, shape index: {}]   ;;  %s1680_s8 = inlined_call_operand.vmem [shape: bf16[2,64,32], index: 8, kind: input, shape index: {}]   ;;  %s1681_s9 = inlined_call_operand.vmem [shape: f32[10,32], index: 9, kind: output, shape index: {}]  }
   0x1 LB: > { %s1486_s10 = sadd.s32 4294967295, %s1420_s30   ;;  %p1234_p0 = scmp.ge.s32.totalorder %s1420_s30, 1  ;;  %s1420_s30 = sphi %s1480_s30, %s19_s30  }
   0x2   : > { %p337_p1 = scmp.lt.s32.totalorder %s1420_s30, 3 }
   0x4   : > { %p338_p2 = pnand %p1234_p0, %p337_p1 }
   0x5   : > { %p393_p3 = scmp.lt.s32.totalorder (!%p338_p2), %s1486_s10, 1  ;;  %p1244_p4 = scmp.ne.s32.totalorder (!%p338_p2), %s1486_s10, 0 }
   0x6   : > { %341 = sbr.rel (%p338_p2) target bundleno = 2870 (0xb36), region = 56 }
   0xd   : > { %s1492_s11 = scalar_select %p393_p3, %s1486_s10, 1 }
   0xe   : > { %427 = sbr.rel (%p1244_p4) target bundleno = 333 (0x14d), region = 60  ;;  %v428_v0 = vld [vmem:[%s1672_s0] sm:$0xff] (!%p1244_p4)  ;;  %vm432_vm0 = vcmask (!%p1244_p4), 261120   ;;  %v429_v1 = vld [vmem:[%s1672_s0 + $0x8] sm:$0x3] (!%p1244_p4)  ;;  %vm436_vm1 = vcmask (!%p1244_p4), 254976  }
   0xf   : > { %s1270_s12 = sshll.u32 %s1492_s11, 4  ;;  %s400_s15 = scalar_lea.vmem %s1675_s3, %s1492_s11  ;;  %v433_v2 = vsel (!%p1244_p4), %vm432_vm0, %v428_v0, 0.0  ;;  %v437_v3 = vsel (!%p1244_p4), %vm436_vm1, %v429_v1, 0.0  ;;  %v1245_v21 = vld [vmem:[%s1673_s1] ss:$0 sm:$0xff] (!%p1244_p4) }
  0x10   : > { %s1502_s18 = scalar_lea.vmem %s1674_s2, %s1270_s12  ;;  %s1507_s21 = scalar_lea.vmem %s1676_s4, %s1270_s12  ;;  %434 = vadd.xlane.f32.xlu0 (!%p1244_p4), %v433_v2  ;;  %v1246_v23 = vld [vmem:[%s1673_s1 + $0x1] ss:$0 sm:$0xff] (!%p1244_p4) }
  0x11   : > { %s1239_s22 = sshll.u32 %s1492_s11, 3  ;;  %s1513_s25 = scalar_lea.vmem %s1678_s6, %s1270_s12 }
  0x12   : > { %s1518_s28 = scalar_lea.vmem %s1677_s5, %s1239_s22  ;;  %s417_s14 = scalar_lea.vmem %s1679_s7, %s1492_s11 }
  0x13   : > { %s1273_s16 = sshll.u32 %s1492_s11, 5 }
  0x14   : > { %s1528_s20 = scalar_lea.vmem %s1680_s8, %s1273_s16  ;;  %438 = vadd.xlane.f32.xlu0 (!%p1244_p4), %v437_v3 }
  0x9d   : > { %v435_v4 = vpop.xlane.xlu0 %434 }
  0x9e   : > { %v441_v5 = vmul.f32 0.03125, %v435_v4 }
  0xa0   : > { %v443_v6 = vsub.f32 %v428_v0, %v441_v5 }
  0xa1   : > { %v439_v7 = vpop.xlane.xlu0 %438 }
  0xa2   : > { %v442_v8 = vmul.f32 0.03125, %v439_v7  ;;  %v445_v9 = vmul.f32 %v443_v6, %v443_v6 }
  0xa4   : > { %v444_v10 = vsub.f32 %v429_v1, %v442_v8  ;;  %v447_v11 = vsel %vm432_vm0, %v445_v9, 0.0 }
  0xa5   : > { %448 = vadd.xlane.f32.xlu1 %v447_v11 }
  0xa6   : > { %v446_v12 = vmul.f32 %v444_v10, %v444_v10 }
  0xa8   : > { %v450_v13 = vsel %vm436_vm1, %v446_v12, 0.0 }
  0xa9   : > { %451 = vadd.xlane.f32.xlu1 %v450_v13 }
 0x132   : > { %v449_v14 = vpop.xlane.xlu1 %448 }
 0x133   : > { %v453_v15 = vmul.f32 0.03125, %v449_v14 }
 0x135   : > { %v455_v16 = vadd.f32 1e-12, %v453_v15 }
 0x136   : > { %v452_v17 = vpop.xlane.xlu1 %451 }
 0x137   : > { %1372 = vrsqrt.f32 %v455_v16  ;;  %v454_v18 = vmul.f32 0.03125, %v452_v17 }
 0x139   : > { %v456_v19 = vadd.f32 1e-12, %v454_v18 }
 0x13b   : > { %1374 = vrsqrt.f32 %v456_v19 }
 0x141   : > { %v1373_v20 = vpop.eup %1372 }
 0x142   : > { %v459_v22 = vmul.f32 %v1373_v20, %v443_v6 }
 0x144   : > { %v465_v24 = vmul.f32 %v1245_v21, %v459_v22 }
 0x145   : > { %v1375_v25 = vpop.eup %1374 }
 0x146   : > { %v471_v26 = vadd.f32 %v1246_v23, %v465_v24  ;;  %v460_v27 = vmul.f32 %v1375_v25, %v444_v10 }
 0x148   : > { %473 = vst.msk [vmem:[#allocation2] sm:$0xff] %vm432_vm0, %v471_v26  ;;  %v466_v28 = vmul.f32 %v1245_v21, %v460_v27 }
 0x14a   : > { %v472_v29 = vadd.f32 %v1246_v23, %v466_v28 }
 0x14c   : > { %474 = vst.msk [vmem:[#allocation2 + $0x8] sm:$0x3] %vm436_vm1, %v472_v29 }
 0x14d PF: > { %v1376_v30 = vld [vmem:[%s1502_s18] sm:$0xff]   ;;  %v1422_v31 = vmov 0.0   ;;  %v1377_v32 = vld [vmem:[%s1502_s18 + $0x8] sm:$0xff]   ;;  %vm1423_vm2 = vmmov 0   ;;  %vm502_vm3 = vcmask 261120   ;;  %s1424_s17 = smov 112  }
 0x14e   : > { %1296 = vmatprep.subr.bf16.mxu0 %v1422_v31  ;;  %1304 = vmatprep.subr.bf16.mxu1 %v1422_v31  ;;  %v1247_v36 = vld [vmem:[%s400_s15] ss:$0 sm:$0xff]  ;;  %s1425_s19 = smov 96   ;;  %s1426_s12 = smov 80   ;;  %vm551_vm4 = vcmask 130048   ;;  %vm599_vm5 = vcmask 80896  }
 0x14f   : > { %1297 = vmatpush3.bf16.msra.mxu0 %v1376_v30  ;;  %1300 = vmatprep.mubr.msk.bf16.mxu0 %vm1423_vm2, %v1422_v31  ;;  %v1555_v33 = vld [vmem:[#allocation2] sm:$0xff]  ;;  %vm603_vm6 = vcmask 74752   ;;  %s1427_s15 = smov 48   ;;  %s1428_s23 = smov 64   ;;  %vm629_vm7 = vcmask 1044480   ;;  %vm675_vm8 = vcmask 123904  }
 0x150   : > { %1298 = vmatprep.subr.bf16.mxu0 %v1422_v31  ;;  %1306 = vmatprep.mubr.msk.bf16.mxu1 %vm1423_vm2, %v1422_v31  ;;  %s1429_s22 = smov 16   ;;  %vm808_vm9 = vcmask 261248   ;;  %vm810_vm10 = vcmask 255104   ;;  %vm884_vm11 = vcmask 254976   ;;  %vm1044_vm12 = vcmask 523264   ;;  %p1267_p5 = scmp.ne.s32.totalorder %s1486_s10, 1 }
 0x153   : > { %v1557_v34 = vld [vmem:[#allocation2 + $0x8] sm:$0x3]  ;;  %1299 = vmatpush3.bf16.msra.mxu0 %v1377_v32 }
 0x154   : > { %v482_v35 = vpack.c.bf16 %v1557_v34, %v1555_v33  ;;  %1310 = vmatprep.subr.bf16.mxu0 %v1422_v31 }
 0x156   : > { %1301 = vmatmul.mubr.msk.bf16.vlgmr.msra.gmra.mrb[0].mxu0 %vm502_vm3, %v482_v35 }
 0x157   : > { %1312 = vmatprep.mubr.msk.bf16.mxu0 %vm1423_vm2, %v1422_v31 }
 0x229   : > { %v540_v37 = vpop.f32.mrb[0].mxu0 }
 0x22a   : > { %v1302_v38 = vpop.f32.mrb[1].mxu0  ;;  %v541_v40 = vadd.f32 %v1247_v36, %v540_v37 }
 0x22b   : > { %v543_v39 = vpop.f32.mrb[2].mxu0  ;;  %v1378_v38 = vld [vmem:[%s1507_s21] sm:$0xff]  }
 0x22c   : > { %v544_v41 = vadd.f32 %v1247_v36, %v543_v39  ;;  %v1303_v42 = vpop.f32.mrb[3].mxu0 }
 0x22e   : > { %v1573_v43 = vpack.c.bf16 %v544_v41, %v541_v40  ;;  %v1379_v40 = vld [vmem:[%s1507_s21 + $0x8] sm:$0xff]  }
 0x230   : > { %677 = vrot.lane.b32.xlu1 %v1573_v43, %s1424_s17  ;;  %549 = vrot.lane.b32.xlu0 %v1573_v43, %s1425_s19 }
 0x234   : > { %679 = vrot.lane.b32.xlu0 %v1573_v43, %s1426_s12 }
 0x2a2   : > { %v550_v44 = vpop.permute.xlu0 %549  ;;  %v678_v48 = vpop.permute.xlu1 %677 }
 0x2a3   : > { %v556_v45 = vsel %vm551_vm4, %v550_v44, 0 }
 0x2a4   : > { %1305 = vmatpush3.bf16.xpose.msra.mxu1 %v556_v45 }
 0x2a5   : > { %1316 = vmatprep.subr.bf16.mxu1 %v1422_v31 }
 0x2a6   : > { %v680_v46 = vpop.permute.xlu0 %679 }
 0x2a7   : > { %v685_v47 = vsel %vm551_vm4, %v680_v46, 0 }
 0x2ab   : > { %1307 = vmatmul.mubr.msk.bf16.vlgmr.msra.gmra.mrb[0].mxu1 %vm551_vm4, %v1573_v43 }
 0x2ac   : > { %1317 = vmatpush3.bf16.xpose.msra.mxu1 %v685_v47  ;;  %1318 = vmatprep.mubr.msk.bf16.mxu1 %vm1423_vm2, %v1422_v31 }
 0x2ad   : > { %1328 = vmatprep.subr.bf16.mxu1 %v1422_v31 }
 0x2b3   : > { %1319 = vmatmul.mubr.msk.bf16.vlgmr.msra.gmra.mrb[4].mxu1 %vm551_vm4, %v678_v48 }
 0x2b4   : > { %1332 = vmatprep.mubr.msk.bf16.mxu1 %vm1423_vm2, %v1422_v31  ;;  %1329 = vmatpush3.bf16.msra.mxu1 %v1378_v38  ;;  %v1384_v38 = vld [vmem:[%s1528_s20 + $0x10] sm:$0xff]  }
 0x2b5   : > { %1330 = vmatprep.subr.bf16.mxu1 %v1422_v31 }
 0x2b8   : > { %1331 = vmatpush3.bf16.msra.mxu1 %v1379_v40  ;;  %v1258_v40 = vld [vmem:[%s417_s14] ss:$0 sm:$0xff] }
 0x2b9   : > { %1344 = vmatprep.subr.bf16.mxu1 %v1422_v31 }
 0x37e   : > { %v592_v49 = vpop.f32.mrb[0].mxu1 }
 0x37f   : > { %v1308_v50 = vpop.f32.mrb[1].mxu1  ;;  %v600_v51 = vsel %vm599_vm5, %v592_v49, -inf }
 0x380   : > { %601 = vmax.xlane.f32.xlu1 %v600_v51  ;;  %v595_v52 = vpop.f32.mrb[2].mxu1 }
 0x381   : > { %v1309_v53 = vpop.f32.mrb[3].mxu1  ;;  %v604_v54 = vsel %vm603_vm6, %v595_v52, -inf }
 0x382   : > { %605 = vmax.xlane.f32.xlu0 %v604_v54  ;;  %v819_v53 = vlaneseq }
 0x384   : > { %v1615_v54 = vshrl.u32 %v819_v53, 7 }
 0x386   : > { %v721_v55 = vpop.f32.mrb[4].mxu1 }
 0x387   : > { %v1320_v56 = vpop.f32.mrb[5].mxu1  ;;  %v728_v57 = vsel %vm599_vm5, %v721_v55, -inf }
 0x388   : > { %729 = vmax.xlane.f32.xlu0 %v728_v57  ;;  %v724_v58 = vpop.f32.mrb[6].mxu1  ;;  %v1619_v56 = vld [vmem:[%s1518_s28] sm:$0x3f] }
 0x389   : > { %v1321_v59 = vpop.f32.mrb[7].mxu1  ;;  %v731_v60 = vsel %vm603_vm6, %v724_v58, -inf }
 0x38a   : > { %732 = vmax.xlane.f32.xlu1 %v731_v60 }
 0x40d   : > { %v602_v61 = vpop.xlane.xlu1 %601 }
 0x40e   : > { %v607_v62 = vsub.f32 %v592_v49, %v602_v61 }
 0x40f   : > { %v606_v63 = vpop.xlane.xlu0 %605 }
 0x410   : > { %v609_v0 = vmul.f32 1.442695, %v607_v62  ;;  %v608_v1 = vsub.f32 %v595_v52, %v606_v63 }
 0x412   : > { %1386 = vpow2.f32 %v609_v0  ;;  %v611_v2 = vmul.f32 1.442695, %v608_v1 }
 0x414   : > { %1388 = vpow2.f32 %v611_v2 }
 0x415   : > { %v730_v3 = vpop.xlane.xlu0 %729 }
 0x416   : > { %v734_v4 = vsub.f32 %v721_v55, %v730_v3  ;;  %v821_v55 = vsub.s32 0, %v1615_v54 }
 0x417   : > { %v733_v5 = vpop.xlane.xlu1 %732 }
 0x418   : > { %v736_v6 = vmul.f32 1.442695, %v734_v4  ;;  %v735_v7 = vsub.f32 %v724_v58, %v733_v5  ;;  %v822_v57 = vrot.slane %v1619_v56, %v821_v55 }
 0x41a   : > { %1390 = vpow2.f32 %v736_v6  ;;  %v738_v8 = vmul.f32 1.442695, %v735_v7 }
 0x41c   : > { %v1387_v9 = vpop.eup %1386  ;;  %1392 = vpow2.f32 %v738_v8 }
 0x41d   : > { %v613_v10 = vsel %vm599_vm5, %v1387_v9, 0.0 }
 0x41e   : > { %v1389_v11 = vpop.eup %1388  ;;  %614 = vadd.xlane.f32.xlu0 %v613_v10 }
 0x41f   : > { %v616_v12 = vsel %vm603_vm6, %v1389_v11, 0.0 }
 0x420   : > { %617 = vadd.xlane.f32.xlu1 %v616_v12 }
 0x424   : > { %v1391_v13 = vpop.eup %1390 }
 0x425   : > { %v740_v14 = vsel %vm599_vm5, %v1391_v13, 0.0 }
 0x426   : > { %v1393_v15 = vpop.eup %1392  ;;  %741 = vadd.xlane.f32.xlu0 %v740_v14 }
 0x427   : > { %v743_v16 = vsel %vm603_vm6, %v1393_v15, 0.0 }
 0x428   : > { %744 = vadd.xlane.f32.xlu1 %v743_v16 }
 0x439   : > { %751 = vrot.lane.b32.xlu1 %v1573_v43, %s1427_s15 }
 0x43c   : > { %624 = vrot.lane.b32.xlu0 %v1573_v43, %s1428_s23 }
 0x4ab   : > { %v615_v17 = vpop.xlane.xlu0 %614 }
 0x4ac   : > { %1394 = vrcp.f32 %v615_v17 }
 0x4ad   : > { %v618_v18 = vpop.xlane.xlu1 %617 }
 0x4ae   : > { %1396 = vrcp.f32 %v618_v18 }
 0x4b3   : > { %v742_v19 = vpop.xlane.xlu0 %741 }
 0x4b4   : > { %1398 = vrcp.f32 %v742_v19 }
 0x4b5   : > { %v745_v20 = vpop.xlane.xlu1 %744 }
 0x4b6   : > { %v1395_v21 = vpop.eup %1394  ;;  %1400 = vrcp.f32 %v745_v20  ;;  %v911_v20 = vsub.s32 1, %v1615_v54 }
 0x4b7   : > { %v625_v22 = vpop.permute.xlu0 %624  ;;  %v621_v25 = vmul.f32 %v1395_v21, %v1387_v9 }
 0x4b8   : > { %v1397_v23 = vpop.eup %1396  ;;  %v631_v24 = vsel %vm629_vm7, %v625_v22, 0  ;;  %v912_v21 = vrot.slane %v1619_v56, %v911_v20  ;;  %v917_v22 = vsub.s32 2, %v1615_v54 }
 0x4b9   : > { %v622_v26 = vmul.f32 %v1397_v23, %v1389_v11  ;;  %1311 = vmatpush3.bf16.msra.mxu0 %v631_v24  ;;  %v752_v27 = vpop.permute.xlu1 %751 }
 0x4ba   : > { %1322 = vmatprep.subr.bf16.mxu0 %v1422_v31  ;;  %v757_v29 = vsel %vm629_vm7, %v752_v27, 0 }
 0x4bb   : > { %v623_v28 = vpack.c.bf16 %v622_v26, %v621_v25 }
 0x4bd   : > { %1313 = vmatmul.mubr.msk.bf16.vlgmr.msra.gmra.mrb[4].mxu0 %vm599_vm5, %v623_v28  ;;  %v918_v28 = vrot.slane %v1619_v56, %v917_v22 }
 0x4be   : > { %v1399_v30 = vpop.eup %1398  ;;  %1323 = vmatpush3.bf16.msra.mxu0 %v757_v29  ;;  %1324 = vmatprep.mubr.msk.bf16.mxu0 %vm1423_vm2, %v1422_v31 }
 0x4bf   : > { %1336 = vmatprep.subr.bf16.mxu0 %v1422_v31  ;;  %v748_v35 = vmul.f32 %v1399_v30, %v1391_v13  ;;  %v1381_v13 = vld [vmem:[%s1513_s25 + $0x8] sm:$0xff]  }
 0x4c0   : > { %v1401_v32 = vpop.eup %1400 }
 0x4c1   : > { %v749_v36 = vmul.f32 %v1401_v32, %v1393_v15 }
 0x4c3   : > { %v750_v37 = vpack.c.bf16 %v749_v36, %v748_v35  ;;  %v1382_v36 = vld [vmem:[%s1528_s20] sm:$0xff]  }
 0x4c5   : > { %1325 = vmatmul.mubr.msk.bf16.vlgmr.msra.gmra.mrb[8].mxu0 %vm599_vm5, %v750_v37  ;;  %v1383_v37 = vld [vmem:[%s1528_s20 + $0x8] sm:$0xff]  }
 0x4c6   : > { %1340 = vmatprep.mubr.msk.bf16.mxu0 %vm1423_vm2, %v1422_v31 }
 0x590   : > { %v667_v39 = vpop.f32.mrb[4].mxu0 }
 0x591   : > { %674 = vst.msk [vmem:[#allocation3] sm:$0xff] %vm551_vm4, %v667_v39  ;;  %v1314_v41 = vpop.f32.mrb[5].mxu0  ;;  %v1385_v39 = vld [vmem:[%s1528_s20 + $0x18] sm:$0xff]  }
 0x592   : > { %v670_v42 = vpop.f32.mrb[6].mxu0 }
 0x593   : > { %676 = vst.msk [vmem:[#allocation3 + $0x8] sm:$0x3] %vm675_vm8, %v670_v42  ;;  %v1315_v43 = vpop.f32.mrb[7].mxu0 }
 0x598   : > { %v793_v44 = vpop.f32.mrb[8].mxu0 }
 0x599   : > { %802 = vrot.lane.b32.xlu1 %v793_v44, %s1429_s22  ;;  %v1326_v45 = vpop.f32.mrb[9].mxu0 }
 0x59a   : > { %v796_v46 = vpop.f32.mrb[10].mxu0 }
 0x59b   : > { %804 = vrot.lane.b32.xlu0 %v796_v46, %s1429_s22  ;;  %v1327_v47 = vpop.f32.mrb[11].mxu0 }
 0x60b   : > { %v803_v48 = vpop.permute.xlu1 %802 }
 0x60c   : > { %809 = vst.msk [vmem:[#allocation3] sm:$0xff] %vm808_vm9, %v803_v48 }
 0x60d   : > { %v805_v49 = vpop.permute.xlu0 %804 }
 0x60e   : > { %811 = vst.msk [vmem:[#allocation3 + $0x8] sm:$0x3] %vm810_vm10, %v805_v49 }
 0x613   : > { %v812_v50 = vld [vmem:[#allocation3] sm:$0xff] }
 0x615   : > { %v813_v51 = vld [vmem:[#allocation3 + $0x8] sm:$0x3] }
 0x616   : > { %v818_v52 = vpack.c.bf16 %v813_v51, %v812_v50 }
 0x618   : > { %1333 = vmatmul.mubr.msk.bf16.vlgmr.msra.gmra.mrb[8].mxu1 %vm502_vm3, %v818_v52 }
 0x619   : > { %1352 = vmatprep.mubr.msk.bf16.mxu1 %vm1423_vm2, %v1422_v31  ;;  %1345 = vmatpush3.bf16.msra.mxu1 %v1382_v36 }
 0x61a   : > { %1346 = vmatprep.subr.bf16.mxu1 %v1422_v31 }
 0x61d   : > { %1347 = vmatpush3.bf16.msra.mxu1 %v1383_v37 }
 0x61e   : > { %1348 = vmatprep.subr.bf16.mxu1 %v1422_v31 }
 0x621   : > { %1349 = vmatpush3.bf16.msra.mxu1 %v1384_v38 }
 0x622   : > { %1350 = vmatprep.subr.bf16.mxu1 %v1422_v31 }
 0x625   : > { %1351 = vmatpush3.bf16.msra.mxu1 %v1385_v39 }
 0x6eb   : > { %v872_v58 = vpop.f32.mrb[8].mxu1 }
 0x6ec   : > { %v873_v59 = vadd.f32 %v872_v58, %v822_v57  ;;  %v1334_v60 = vpop.f32.mrb[9].mxu1 }
 0x6ed   : > { %v875_v61 = vpop.f32.mrb[10].mxu1 }
 0x6ee   : > { %v876_v62 = vadd.f32 %v875_v61, %v822_v57  ;;  %v1335_v63 = vpop.f32.mrb[11].mxu1  ;;  %v879_v0 = vadd.f32 %v873_v59, %v1555_v33 }
 0x6f0   : > { %v881_v1 = vsel %vm502_vm3, %v879_v0, 0.0  ;;  %v880_v2 = vadd.f32 %v876_v62, %v1557_v34  ;;  %v1380_v34 = vld [vmem:[%s1513_s25] sm:$0xff]  }
 0x6f1   : > { %882 = vadd.xlane.f32.xlu1 %v881_v1  ;;  %1337 = vmatpush3.bf16.msra.mxu0 %v1380_v34 }
 0x6f2   : > { %v885_v3 = vsel %vm884_vm11, %v880_v2, 0.0  ;;  %1338 = vmatprep.subr.bf16.mxu0 %v1422_v31 }
 0x6f3   : > { %886 = vadd.xlane.f32.xlu0 %v885_v3  ;;  %v1018_v3 = vsub.s32 3, %v1615_v54 }
 0x6f5   : > { %1339 = vmatpush3.bf16.msra.mxu0 %v1381_v13 }
 0x77e   : > { %v883_v4 = vpop.xlane.xlu1 %882 }
 0x77f   : > { %v889_v5 = vmul.f32 0.03125, %v883_v4  ;;  %v1019_v4 = vrot.slane %v1619_v56, %v1018_v3 }
 0x780   : > { %v887_v6 = vpop.xlane.xlu0 %886 }
 0x781   : > { %v891_v7 = vsub.f32 %v879_v0, %v889_v5  ;;  %v890_v8 = vmul.f32 0.03125, %v887_v6 }
 0x783   : > { %v892_v9 = vsub.f32 %v880_v2, %v890_v8  ;;  %v893_v10 = vmul.f32 %v891_v7, %v891_v7 }
 0x785   : > { %v895_v33 = vsel %vm502_vm3, %v893_v10, 0.0  ;;  %v894_v11 = vmul.f32 %v892_v9, %v892_v9 }
 0x786   : > { %896 = vadd.xlane.f32.xlu0 %v895_v33 }
 0x787   : > { %v898_v12 = vsel %vm884_vm11, %v894_v11, 0.0 }
 0x788   : > { %899 = vadd.xlane.f32.xlu1 %v898_v12 }
 0x813   : > { %v897_v14 = vpop.xlane.xlu0 %896 }
 0x814   : > { %v901_v15 = vmul.f32 0.03125, %v897_v14 }
 0x815   : > { %v900_v16 = vpop.xlane.xlu1 %899 }
 0x816   : > { %v903_v17 = vadd.f32 1e-12, %v901_v15  ;;  %v902_v18 = vmul.f32 0.03125, %v900_v16 }
 0x818   : > { %1402 = vrsqrt.f32 %v903_v17  ;;  %v904_v19 = vadd.f32 1e-12, %v902_v18 }
 0x81a   : > { %1404 = vrsqrt.f32 %v904_v19 }
 0x822   : > { %v1403_v23 = vpop.eup %1402 }
 0x823   : > { %v907_v24 = vmul.f32 %v1403_v23, %v891_v7 }
 0x824   : > { %v1405_v25 = vpop.eup %1404 }
 0x825   : > { %v913_v26 = vmul.f32 %v912_v21, %v907_v24  ;;  %v908_v27 = vmul.f32 %v1405_v25, %v892_v9 }
 0x827   : > { %v914_v29 = vmul.f32 %v912_v21, %v908_v27  ;;  %v919_v30 = vadd.f32 %v918_v28, %v913_v26 }
 0x829   : > { %v920_v32 = vadd.f32 %v918_v28, %v914_v29  ;;  %v1119_v29 = vsub.s32 4, %v1615_v54 }
 0x82b   : > { %v925_v35 = vpack.c.bf16 %v920_v32, %v919_v30 }
 0x82d   : > { %1341 = vmatmul.mubr.msk.bf16.vlgmr.msra.gmra.mrb[12].mxu0 %vm502_vm3, %v925_v35 }
 0x900   : > { %v982_v41 = vpop.f32.mrb[12].mxu0 }
 0x901   : > { %v983_v42 = vadd.f32 %v1258_v40, %v982_v41  ;;  %v1342_v43 = vpop.f32.mrb[13].mxu0 }
 0x902   : > { %v985_v44 = vpop.f32.mrb[14].mxu0 }
 0x903   : > { %v989_v45 = vmul.f32 %v983_v42, %v983_v42  ;;  %v986_v46 = vadd.f32 %v1258_v40, %v985_v44  ;;  %v1343_v47 = vpop.f32.mrb[15].mxu0 }
 0x905   : > { %v991_v48 = vmul.f32 %v989_v45, %v983_v42  ;;  %v990_v49 = vmul.f32 %v986_v46, %v986_v46 }
 0x907   : > { %v993_v50 = vmul.f32 0.044715, %v991_v48  ;;  %v992_v51 = vmul.f32 %v990_v49, %v986_v46 }
 0x909   : > { %v995_v52 = vadd.f32 %v993_v50, %v983_v42  ;;  %v994_v31 = vmul.f32 0.044715, %v992_v51 }
 0x90b   : > { %v997_v53 = vmul.f32 0.7978846, %v995_v52  ;;  %v996_v55 = vadd.f32 %v994_v31, %v986_v46 }
 0x90d   : > { %1406 = vtanh.f32 %v997_v53  ;;  %v998_v57 = vmul.f32 0.7978846, %v996_v55 }
 0x90f   : > { %1408 = vtanh.f32 %v998_v57 }
 0x917   : > { %v1407_v58 = vpop.eup %1406 }
 0x918   : > { %v1001_v59 = vadd.f32 1.0, %v1407_v58 }
 0x919   : > { %v1409_v60 = vpop.eup %1408 }
 0x91a   : > { %v1003_v61 = vmul.f32 0.5, %v1001_v59  ;;  %v1002_v62 = vadd.f32 1.0, %v1409_v60 }
 0x91c   : > { %v1004_v63 = vmul.f32 0.5, %v1002_v62  ;;  %v1005_v0 = vmul.f32 %v1003_v61, %v983_v42 }
 0x91e   : > { %v1006_v1 = vmul.f32 %v1004_v63, %v986_v46 }
 0x920   : > { %v1015_v2 = vpack.c.bf16 %v1006_v1, %v1005_v0 }
 0x922   : > { %1353 = vmatmul.mubr.msk.bf16.vlgmr.msra.gmra.mrb[12].mxu1 %vm1044_vm12, %v1015_v2 }
 0x9f5   : > { %v1082_v5 = vpop.f32.mrb[12].mxu1 }
 0x9f6   : > { %v1083_v6 = vadd.f32 %v1082_v5, %v1019_v4  ;;  %v1354_v7 = vpop.f32.mrb[13].mxu1 }
 0x9f7   : > { %v1085_v8 = vpop.f32.mrb[14].mxu1 }
 0x9f8   : > { %v1086_v9 = vadd.f32 %v1085_v8, %v1019_v4  ;;  %v1355_v10 = vpop.f32.mrb[15].mxu1  ;;  %v1089_v33 = vadd.f32 %v1083_v6, %v919_v30  ;;  %v1125_v30 = vsub.s32 5, %v1615_v54 }
 0x9fa   : > { %v1091_v11 = vsel %vm502_vm3, %v1089_v33, 0.0  ;;  %v1090_v12 = vadd.f32 %v1086_v9, %v920_v32  ;;  %v1120_v32 = vrot.slane %v1619_v56, %v1119_v29  ;;  %v1126_v36 = vrot.slane %v1619_v56, %v1125_v30 }
 0x9fb   : > { %1092 = vadd.xlane.f32.xlu0 %v1091_v11 }
 0x9fc   : > { %v1094_v34 = vsel %vm884_vm11, %v1090_v12, 0.0 }
 0x9fd   : > { %1095 = vadd.xlane.f32.xlu1 %v1094_v34 }
 0xa88   : > { %v1093_v13 = vpop.xlane.xlu0 %1092 }
 0xa89   : > { %v1097_v14 = vmul.f32 0.03125, %v1093_v13 }
 0xa8a   : > { %v1096_v15 = vpop.xlane.xlu1 %1095 }
 0xa8b   : > { %v1099_v16 = vsub.f32 %v1089_v33, %v1097_v14  ;;  %v1098_v17 = vmul.f32 0.03125, %v1096_v15 }
 0xa8d   : > { %v1100_v18 = vsub.f32 %v1090_v12, %v1098_v17  ;;  %v1101_v19 = vmul.f32 %v1099_v16, %v1099_v16 }
 0xa8f   : > { %v1103_v20 = vsel %vm502_vm3, %v1101_v19, 0.0  ;;  %v1102_v21 = vmul.f32 %v1100_v18, %v1100_v18 }
 0xa90   : > { %1104 = vadd.xlane.f32.xlu0 %v1103_v20 }
 0xa91   : > { %v1106_v22 = vsel %vm884_vm11, %v1102_v21, 0.0 }
 0xa92   : > { %1107 = vadd.xlane.f32.xlu1 %v1106_v22 }
 0xb1d   : > { %v1105_v23 = vpop.xlane.xlu0 %1104 }
 0xb1e   : > { %v1109_v24 = vmul.f32 0.03125, %v1105_v23 }
 0xb1f   : > { %v1108_v25 = vpop.xlane.xlu1 %1107 }
 0xb20   : > { %v1111_v26 = vadd.f32 1e-12, %v1109_v24  ;;  %v1110_v27 = vmul.f32 0.03125, %v1108_v25 }
 0xb22   : > { %1410 = vrsqrt.f32 %v1111_v26  ;;  %v1112_v28 = vadd.f32 1e-12, %v1110_v27 }
 0xb24   : > { %1412 = vrsqrt.f32 %v1112_v28 }
 0xb2c   : > { %v1411_v35 = vpop.eup %1410 }
 0xb2d   : > { %v1115_v37 = vmul.f32 %v1411_v35, %v1099_v16 }
 0xb2e   : > { %v1413_v38 = vpop.eup %1412 }
 0xb2f   : > { %v1121_v39 = vmul.f32 %v1120_v32, %v1115_v37  ;;  %v1116_v40 = vmul.f32 %v1413_v38, %v1100_v18  ;;  %1134 = sbr.rel (%p1267_p5) target bundleno = 2870 (0xb36), region = 64 }
 0xb31   : > { %v1127_v41 = vadd.f32 %v1126_v36, %v1121_v39  ;;  %v1122_v42 = vmul.f32 %v1120_v32, %v1116_v40 }
 0xb33   : > { %1129 = vst.msk [vmem:[#allocation2] sm:$0xff] %vm502_vm3, %v1127_v41  ;;  %v1128_v43 = vadd.f32 %v1126_v36, %v1122_v42  ;;  %1135 = vst.msk [vmem:[%s1681_s9] sm:$0xff] (!%p1267_p5), %vm502_vm3, %v1127_v41 }
 0xb35   : > { %1130 = vst.msk [vmem:[#allocation2 + $0x8] sm:$0x3] %vm884_vm11, %v1128_v43  ;;  %1136 = vst.msk [vmem:[%s1681_s9 + $0x8] sm:$0x3] (!%p1267_p5), %vm884_vm11, %v1128_v43 }
 0xb36 PF: > { %s19_s30 = sadd.s32 1, %s1420_s30  }
 0xb37   : > { %p16_p6 = scmp.ge.s32.totalorder %s19_s30, 4  }
 0xb39   :  { %18 = sbr.rel (!%p16_p6) target bundleno = 1 (0x1), region = 108 }

</bundles_post_ra>
